<compile_context>
chip_gen: v6e
topology: v6e:2x2x1
jax: 0.10.0
libtpu: 0.0.40
codegen_flags: <defaults>
</compile_context>

<pallas_src>
import functools

import numpy as np
import jax
import jax.numpy as jnp
from jax.experimental import pallas as pl
from jax.experimental.pallas import tpu as pltpu


# --------------------------------------------------------------------------- fused kernel
def _dqn_fused_kernel(p1_ref, w1c_ref, b1c_ref, g2_ref, w2c_ref, b2c_ref,
                      w1f_ref, b1f_ref, w2f_ref, b2f_ref, q_ref,
                      *, n_taps, n_pos, batch):
    """Entire DQN forward on VMEM-resident tiles.

    p1_ref : (B*H1*W1, C0*kh1*kw1)        conv1 im2col patches, rows = (b, oh1, ow1)
    w1c_ref: (C0*kh1*kw1, C1)             conv1 weight (pre-transposed at init)
    g2_ref : (n_taps, B*n_pos, B*H1*W1)   one-hot selectors = in-kernel im2col for conv2
    w2c_ref: (n_taps, C1, C2)             conv2 weight, one (C1,C2) slab per kernel tap
    w1f_ref: (n_pos, C2, hidden)          fc1 weight, rows pre-permuted to kernel layout
    w2f_ref: (hidden, out)                fc2 weight
    biases : (1, N) each.
    """
    f32 = jnp.float32

    # ---- conv1 + ReLU : one MXU matmul -------------------------------------------------
    a1 = jnp.dot(p1_ref[...], w1c_ref[...], preferred_element_type=f32)
    a1 = jnp.maximum(a1 + b1c_ref[...], 0.0)                       # (B*H1*W1, C1)

    # ---- conv2 + ReLU : gather-as-matmul accumulation over the kh2*kw2 taps -------------
    n_rows = batch * n_pos
    c2 = w2c_ref.shape[2]
    acc2 = jnp.zeros((n_rows, c2), f32)
    for t in range(n_taps):                                        # unrolled (9 taps)
        rows = jnp.dot(g2_ref[t], a1, preferred_element_type=f32)  # (B*n_pos, C1) gather
        acc2 = acc2 + jnp.dot(rows, w2c_ref[t], preferred_element_type=f32)
    a2 = jnp.maximum(acc2 + b2c_ref[...], 0.0)                     # (B*n_pos, C2), rows=(pos,b)

    # ---- flatten + fc1 + ReLU : per-spatial-position accumulation -----------------------
    hidden = w1f_ref.shape[2]
    h = jnp.zeros((batch, hidden), f32)
    for p in range(n_pos):                                         # unrolled (9 positions)
        h = h + jnp.dot(a2[p * batch:(p + 1) * batch, :], w1f_ref[p],
                        preferred_element_type=f32)
    h = jnp.maximum(h + b1f_ref[...], 0.0)                         # (B, hidden)

    # ---- fc2 (Q-values, no activation) ---------------------------------------------------
    q = jnp.dot(h, w2f_ref[...], preferred_element_type=f32) + b2f_ref[...]
    q_ref[...] = q.astype(q_ref.dtype)


# --------------------------------------------------------------------------- call wrapper
def _full_spec(shape):
    ndim = len(shape)
    return pl.BlockSpec(shape, lambda i: (0,) * ndim)


def _im2col_conv1(x, kh, kw, sh, sw):
    """Patch matrix for the FIRST conv only (runs once per forward on the raw 4 KB input).
    x: (B,C,H,W) NCHW, valid conv.  Returns (B*Ho*Wo, C*kh*kw), columns in PyTorch's
    (C, kh, kw) order, rows ordered (b, oh, ow)."""
    B, C, H, W = x.shape
    Ho = (H - kh) // sh + 1
    Wo = (W - kw) // sw + 1
    cols = [x[:, :, i:i + sh * Ho:sh, j:j + sw * Wo:sw] for i in range(kh) for j in range(kw)]
    p = jnp.stack(cols, axis=2)                                    # (B, C, kh*kw, Ho, Wo)
    p = p.reshape(B, C * kh * kw, Ho, Wo).transpose(0, 2, 3, 1)
    return p.reshape(B * Ho * Wo, C * kh * kw)


def dqn_forward(observation, prep, meta):
    """observation: (B, C, H, W) float32 NCHW.  Returns Q-values (B, output_size)."""
    batch = observation.shape[0]
    kh1, kw1 = meta["conv1_kernel"]
    sh1, sw1 = meta["conv1_stride"]
    p1 = _im2col_conv1(observation, kh1, kw1, sh1, sw1)

    out_size = prep["w2f"].shape[1]
    args = (p1, prep["w1c"], prep["b1c"], prep["g2"], prep["w2c"], prep["b2c"],
            prep["w1f"], prep["b1f"], prep["w2f"], prep["b2f"])
    kernel = functools.partial(_dqn_fused_kernel, n_taps=meta["n_taps2"],
                               n_pos=meta["n_pos2"], batch=batch)
    return pl.pallas_call(
        kernel,
        out_shape=jax.ShapeDtypeStruct((batch, out_size), jnp.float32),
        grid=(1,),
        in_specs=[_full_spec(a.shape) for a in args],
        out_specs=pl.BlockSpec((batch, out_size), lambda i: (0, 0)),
        compiler_params=pltpu.CompilerParams(dimension_semantics=("arbitrary",)),
    )(*args)


# --------------------------------------------------------------------------- params
def init_params(key, input_shape, conv_params, hidden_dim, output_size, batch):
    """Synthetic weights matching the PyTorch module's shapes + ONE-TIME kernel preprocessing."""
    assert len(conv_params) == 2, "fused kernel is specialised to the two-conv DQN topology"
    C0, H0, W0 = input_shape
    (ci1, co1, (kh1, kw1), (sh1, sw1)) = conv_params[0]
    (ci2, co2, (kh2, kw2), (sh2, sw2)) = conv_params[1]
    assert ci1 == C0 and ci2 == co1
    H1, W1 = (H0 - kh1) // sh1 + 1, (W0 - kw1) // sw1 + 1
    H2, W2 = (H1 - kh2) // sh2 + 1, (W1 - kw2) // sw2 + 1
    fc_in = co2 * H2 * W2

    ks = jax.random.split(key, 8)
    w1_conv = jax.random.normal(ks[0], (co1, ci1, kh1, kw1), jnp.float32) / float(np.sqrt(ci1 * kh1 * kw1))
    b1_conv = jax.random.normal(ks[1], (co1,), jnp.float32) * 0.01
    w2_conv = jax.random.normal(ks[2], (co2, ci2, kh2, kw2), jnp.float32) / float(np.sqrt(ci2 * kh2 * kw2))
    b2_conv = jax.random.normal(ks[3], (co2,), jnp.float32) * 0.01
    w1_fc = jax.random.normal(ks[4], (fc_in, hidden_dim), jnp.float32) / float(np.sqrt(fc_in))
    b1_fc = jax.random.normal(ks[5], (hidden_dim,), jnp.float32) * 0.01
    w2_fc = jax.random.normal(ks[6], (hidden_dim, output_size), jnp.float32) / float(np.sqrt(hidden_dim))
    b2_fc = jax.random.normal(ks[7], (output_size,), jnp.float32) * 0.01

    n_taps2 = kh2 * kw2
    n_pos2 = H2 * W2

    # conv1 weight -> (C0*kh1*kw1, C1), columns match the im2col (c, r, s) order.
    w1c = w1_conv.reshape(co1, ci1 * kh1 * kw1).T
    # conv2 in-kernel "im2col": one-hot row selectors over conv1's (b, oh1, ow1) rows.
    q_idx = np.zeros((n_taps2, batch * n_pos2), np.int32)
    for r in range(kh2):
        for s in range(kw2):
            t = r * kw2 + s
            for oh in range(H2):
                for ow in range(W2):
                    for b in range(batch):
                        p_row = (oh * W2 + ow) * batch + b            # rows ordered (pos, b)
                        q_idx[t, p_row] = b * (H1 * W1) + (sh2 * oh + r) * W1 + (sw2 * ow + s)
    g2 = jnp.asarray(np.eye(batch * H1 * W1, dtype=np.float32)[q_idx])  # (taps, B*P2, B*H1*W1)
    # conv2 weight: one (C1, C2) slab per tap, tap order (r, s) matching g2.
    w2c = jnp.transpose(w2_conv, (2, 3, 1, 0)).reshape(n_taps2, ci2, co2)
    # fc1 weight: rows permuted from PyTorch's (c, oh, ow) flatten order into per-position slabs
    # so the kernel consumes conv2 output directly in its (pos, b) row layout.
    w1f = jnp.transpose(w1_fc.reshape(co2, n_pos2, hidden_dim), (1, 0, 2))  # (P2, C2, hidden)

    prep = dict(
        w1c=w1c, b1c=b1_conv.reshape(1, co1),
        g2=g2, w2c=w2c, b2c=b2_conv.reshape(1, co2),
        w1f=w1f, b1f=b1_fc.reshape(1, hidden_dim),
        w2f=w2_fc, b2f=b2_fc.reshape(1, output_size),
    )
    raw = dict(w1_conv=w1_conv, b1_conv=b1_conv, stride1=(sh1, sw1),
               w2_conv=w2_conv, b2_conv=b2_conv, stride2=(sh2, sw2),
               w1_fc=w1_fc, b1_fc=b1_fc, w2_fc=w2_fc, b2_fc=b2_fc)
    meta = dict(conv1_kernel=(kh1, kw1), conv1_stride=(sh1, sw1),
                n_taps2=n_taps2, n_pos2=n_pos2, fc_in=fc_in)
    return prep, raw, meta


# --------------------------------------------------------------------------- host reference
def _numpy_reference(x, raw):
    """Direct-definition float64 reference of the DQN forward (host-side validation)."""
    def conv_relu(inp, w, b, stride):
        B, C, H, W = inp.shape
        co, ci, kh, kw = w.shape
        sh, sw = stride
        Ho, Wo = (H - kh) // sh + 1, (W - kw) // sw + 1
        w2 = w.reshape(co, ci * kh * kw)
        out = np.zeros((B, co, Ho, Wo), np.float64)
        for oh in range(Ho):
            for ow in range(Wo):
                patch = inp[:, :, oh * sh:oh * sh + kh, ow * sw:ow * sw + kw].reshape(B, -1)
                out[:, :, oh, ow] = patch @ w2.T + b
        return np.maximum(out, 0.0)

    a = np.asarray(x, np.float64)
    a = conv_relu(a, np.asarray(raw["w1_conv"], np.float64),
                  np.asarray(raw["b1_conv"], np.float64), raw["stride1"])
    a = conv_relu(a, np.asarray(raw["w2_conv"], np.float64),
                  np.asarray(raw["b2_conv"], np.float64), raw["stride2"])
    feats = a.reshape(a.shape[0], -1)
    h = np.maximum(feats @ np.asarray(raw["w1_fc"], np.float64)
                   + np.asarray(raw["b1_fc"], np.float64), 0.0)
    return h @ np.asarray(raw["w2_fc"], np.float64) + np.asarray(raw["b2_fc"], np.float64)


# --------------------------------------------------------------------------- main
if __name__ == "__main__":
    key = jax.random.PRNGKey(0)

    batch = 2
    input_shape = (4, 16, 16)                    # (C, H, W); PyTorch conv input is NCHW
    conv_params = [
        (4, 8, (3, 3), (2, 2)),                  # (in_c, out_c, kernel, stride), padding=0
        (8, 16, (3, 3), (2, 2)),
    ]
    hidden_layers_dim = 32
    output_size = 6

    key, pkey, xkey = jax.random.split(key, 3)
    prep, raw, meta = init_params(pkey, input_shape, conv_params,
                                  hidden_layers_dim, output_size, batch)
    x = jax.random.normal(xkey, (batch,) + input_shape, jnp.float32)

    fwd = jax.jit(lambda obs, p: dqn_forward(obs, p, meta))
    q_values = fwd(x, prep)
    jax.block_until_ready(q_values)

    assert q_values.shape == (batch, output_size), q_values.shape
    assert q_values.dtype == jnp.float32

    # Numerical check vs float64 host reference (loose tol: MXU f32 matmuls use bf16-pass
    # precision by default).
    q_ref = _numpy_reference(np.asarray(x), raw)
    err = float(np.max(np.abs(np.asarray(q_values, np.float64) - q_ref)))
    assert err < 5e-2, f"max abs error vs reference too large: {err}"

    print("KERNEL_OK")
</pallas_src>

<mosaic_0001>
module attributes {stable_mosaic.version = 11 : i64} {
  func.func @_dqn_fused_kernel(%arg0: i32, %arg1: memref<98x36xf32, #tpu.memory_space<vmem>>, %arg2: memref<36x8xf32, #tpu.memory_space<vmem>>, %arg3: memref<1x8xf32, #tpu.memory_space<vmem>>, %arg4: memref<9x18x98xf32, #tpu.memory_space<vmem>>, %arg5: memref<9x8x16xf32, #tpu.memory_space<vmem>>, %arg6: memref<1x16xf32, #tpu.memory_space<vmem>>, %arg7: memref<9x16x32xf32, #tpu.memory_space<vmem>>, %arg8: memref<1x32xf32, #tpu.memory_space<vmem>>, %arg9: memref<32x6xf32, #tpu.memory_space<vmem>>, %arg10: memref<1x6xf32, #tpu.memory_space<vmem>>, %arg11: memref<2x6xf32, #tpu.memory_space<vmem>>) attributes {dimension_semantics = [#tpu.dimension_semantics<arbitrary>], iteration_bounds = array<i64: 1>, scalar_prefetch = 0 : i64, scratch_operands = 0 : i64, tpu.core_type = #tpu.core_type<tc>, window_params = [{pipeline_mode = #tpu.pipeline_mode<synchronous>, transform_indices = @transform_0, window_bounds = array<i64: 98, 36>}, {pipeline_mode = #tpu.pipeline_mode<synchronous>, transform_indices = @transform_1, window_bounds = array<i64: 36, 8>}, {pipeline_mode = #tpu.pipeline_mode<synchronous>, transform_indices = @transform_2, window_bounds = array<i64: 1, 8>}, {pipeline_mode = #tpu.pipeline_mode<synchronous>, transform_indices = @transform_3, window_bounds = array<i64: 9, 18, 98>}, {pipeline_mode = #tpu.pipeline_mode<synchronous>, transform_indices = @transform_4, window_bounds = array<i64: 9, 8, 16>}, {pipeline_mode = #tpu.pipeline_mode<synchronous>, transform_indices = @transform_5, window_bounds = array<i64: 1, 16>}, {pipeline_mode = #tpu.pipeline_mode<synchronous>, transform_indices = @transform_6, window_bounds = array<i64: 9, 16, 32>}, {pipeline_mode = #tpu.pipeline_mode<synchronous>, transform_indices = @transform_7, window_bounds = array<i64: 1, 32>}, {pipeline_mode = #tpu.pipeline_mode<synchronous>, transform_indices = @transform_8, window_bounds = array<i64: 32, 6>}, {pipeline_mode = #tpu.pipeline_mode<synchronous>, transform_indices = @transform_9, window_bounds = array<i64: 1, 6>}, {pipeline_mode = #tpu.pipeline_mode<synchronous>, transform_indices = @transform_10, window_bounds = array<i64: 2, 6>}]} {
    %c0 = arith.constant 0 : index
    %c0_0 = arith.constant 0 : index
    %0 = vector.load %arg1[%c0, %c0_0] : memref<98x36xf32, #tpu.memory_space<vmem>>, vector<98x36xf32>
    %c0_1 = arith.constant 0 : index
    %c0_2 = arith.constant 0 : index
    %1 = vector.load %arg2[%c0_1, %c0_2] : memref<36x8xf32, #tpu.memory_space<vmem>>, vector<36x8xf32>
    %cst = arith.constant dense<0.000000e+00> : vector<98x8xf32>
    %2 = tpu.matmul %0, %1, %cst {dimension_numbers = #tpu.dot_dimension_numbers<[1], [0], [0], [1], [0, 0, 1, 1], [], []>} : vector<98x36xf32>, vector<36x8xf32>, vector<98x8xf32> -> vector<98x8xf32>
    %c0_3 = arith.constant 0 : index
    %c0_4 = arith.constant 0 : index
    %3 = vector.load %arg3[%c0_3, %c0_4] : memref<1x8xf32, #tpu.memory_space<vmem>>, vector<1x8xf32>
    %4 = vector.broadcast %3 : vector<1x8xf32> to vector<98x8xf32>
    %5 = arith.addf %2, %4 : vector<98x8xf32>
    %cst_5 = arith.constant 0.000000e+00 : f32
    %6 = vector.broadcast %cst_5 : f32 to vector<98x8xf32>
    %7 = arith.maximumf %5, %6 : vector<98x8xf32>
    %cst_6 = arith.constant 0.000000e+00 : f32
    %8 = vector.broadcast %cst_6 : f32 to vector<18x16xf32>
    %c0_7 = arith.constant 0 : index
    %c0_8 = arith.constant 0 : index
    %c0_9 = arith.constant 0 : index
    %9 = vector.load %arg4[%c0_7, %c0_8, %c0_9] : memref<9x18x98xf32, #tpu.memory_space<vmem>>, vector<1x18x98xf32>
    %10 = vector.shape_cast %9 : vector<1x18x98xf32> to vector<18x98xf32>
    %cst_10 = arith.constant dense<0.000000e+00> : vector<18x8xf32>
    %11 = tpu.matmul %10, %7, %cst_10 {dimension_numbers = #tpu.dot_dimension_numbers<[1], [0], [0], [1], [0, 0, 1, 1], [], []>} : vector<18x98xf32>, vector<98x8xf32>, vector<18x8xf32> -> vector<18x8xf32>
    %c0_11 = arith.constant 0 : index
    %c0_12 = arith.constant 0 : index
    %c0_13 = arith.constant 0 : index
    %12 = vector.load %arg5[%c0_11, %c0_12, %c0_13] : memref<9x8x16xf32, #tpu.memory_space<vmem>>, vector<1x8x16xf32>
    %13 = vector.shape_cast %12 : vector<1x8x16xf32> to vector<8x16xf32>
    %cst_14 = arith.constant dense<0.000000e+00> : vector<18x16xf32>
    %14 = tpu.matmul %11, %13, %cst_14 {dimension_numbers = #tpu.dot_dimension_numbers<[1], [0], [0], [1], [0, 0, 1, 1], [], []>} : vector<18x8xf32>, vector<8x16xf32>, vector<18x16xf32> -> vector<18x16xf32>
    %15 = arith.addf %8, %14 : vector<18x16xf32>
    %c1 = arith.constant 1 : index
    %c0_15 = arith.constant 0 : index
    %c0_16 = arith.constant 0 : index
    %16 = vector.load %arg4[%c1, %c0_15, %c0_16] : memref<9x18x98xf32, #tpu.memory_space<vmem>>, vector<1x18x98xf32>
    %17 = vector.shape_cast %16 : vector<1x18x98xf32> to vector<18x98xf32>
    %cst_17 = arith.constant dense<0.000000e+00> : vector<18x8xf32>
    %18 = tpu.matmul %17, %7, %cst_17 {dimension_numbers = #tpu.dot_dimension_numbers<[1], [0], [0], [1], [0, 0, 1, 1], [], []>} : vector<18x98xf32>, vector<98x8xf32>, vector<18x8xf32> -> vector<18x8xf32>
    %c1_18 = arith.constant 1 : index
    %c0_19 = arith.constant 0 : index
    %c0_20 = arith.constant 0 : index
    %19 = vector.load %arg5[%c1_18, %c0_19, %c0_20] : memref<9x8x16xf32, #tpu.memory_space<vmem>>, vector<1x8x16xf32>
    %20 = vector.shape_cast %19 : vector<1x8x16xf32> to vector<8x16xf32>
    %cst_21 = arith.constant dense<0.000000e+00> : vector<18x16xf32>
    %21 = tpu.matmul %18, %20, %cst_21 {dimension_numbers = #tpu.dot_dimension_numbers<[1], [0], [0], [1], [0, 0, 1, 1], [], []>} : vector<18x8xf32>, vector<8x16xf32>, vector<18x16xf32> -> vector<18x16xf32>
    %22 = arith.addf %15, %21 : vector<18x16xf32>
    %c2 = arith.constant 2 : index
    %c0_22 = arith.constant 0 : index
    %c0_23 = arith.constant 0 : index
    %23 = vector.load %arg4[%c2, %c0_22, %c0_23] : memref<9x18x98xf32, #tpu.memory_space<vmem>>, vector<1x18x98xf32>
    %24 = vector.shape_cast %23 : vector<1x18x98xf32> to vector<18x98xf32>
    %cst_24 = arith.constant dense<0.000000e+00> : vector<18x8xf32>
    %25 = tpu.matmul %24, %7, %cst_24 {dimension_numbers = #tpu.dot_dimension_numbers<[1], [0], [0], [1], [0, 0, 1, 1], [], []>} : vector<18x98xf32>, vector<98x8xf32>, vector<18x8xf32> -> vector<18x8xf32>
    %c2_25 = arith.constant 2 : index
    %c0_26 = arith.constant 0 : index
    %c0_27 = arith.constant 0 : index
    %26 = vector.load %arg5[%c2_25, %c0_26, %c0_27] : memref<9x8x16xf32, #tpu.memory_space<vmem>>, vector<1x8x16xf32>
    %27 = vector.shape_cast %26 : vector<1x8x16xf32> to vector<8x16xf32>
    %cst_28 = arith.constant dense<0.000000e+00> : vector<18x16xf32>
    %28 = tpu.matmul %25, %27, %cst_28 {dimension_numbers = #tpu.dot_dimension_numbers<[1], [0], [0], [1], [0, 0, 1, 1], [], []>} : vector<18x8xf32>, vector<8x16xf32>, vector<18x16xf32> -> vector<18x16xf32>
    %29 = arith.addf %22, %28 : vector<18x16xf32>
    %c3 = arith.constant 3 : index
    %c0_29 = arith.constant 0 : index
    %c0_30 = arith.constant 0 : index
    %30 = vector.load %arg4[%c3, %c0_29, %c0_30] : memref<9x18x98xf32, #tpu.memory_space<vmem>>, vector<1x18x98xf32>
    %31 = vector.shape_cast %30 : vector<1x18x98xf32> to vector<18x98xf32>
    %cst_31 = arith.constant dense<0.000000e+00> : vector<18x8xf32>
    %32 = tpu.matmul %31, %7, %cst_31 {dimension_numbers = #tpu.dot_dimension_numbers<[1], [0], [0], [1], [0, 0, 1, 1], [], []>} : vector<18x98xf32>, vector<98x8xf32>, vector<18x8xf32> -> vector<18x8xf32>
    %c3_32 = arith.constant 3 : index
    %c0_33 = arith.constant 0 : index
    %c0_34 = arith.constant 0 : index
    %33 = vector.load %arg5[%c3_32, %c0_33, %c0_34] : memref<9x8x16xf32, #tpu.memory_space<vmem>>, vector<1x8x16xf32>
    %34 = vector.shape_cast %33 : vector<1x8x16xf32> to vector<8x16xf32>
    %cst_35 = arith.constant dense<0.000000e+00> : vector<18x16xf32>
    %35 = tpu.matmul %32, %34, %cst_35 {dimension_numbers = #tpu.dot_dimension_numbers<[1], [0], [0], [1], [0, 0, 1, 1], [], []>} : vector<18x8xf32>, vector<8x16xf32>, vector<18x16xf32> -> vector<18x16xf32>
    %36 = arith.addf %29, %35 : vector<18x16xf32>
    %c4 = arith.constant 4 : index
    %c0_36 = arith.constant 0 : index
    %c0_37 = arith.constant 0 : index
    %37 = vector.load %arg4[%c4, %c0_36, %c0_37] : memref<9x18x98xf32, #tpu.memory_space<vmem>>, vector<1x18x98xf32>
    %38 = vector.shape_cast %37 : vector<1x18x98xf32> to vector<18x98xf32>
    %cst_38 = arith.constant dense<0.000000e+00> : vector<18x8xf32>
    %39 = tpu.matmul %38, %7, %cst_38 {dimension_numbers = #tpu.dot_dimension_numbers<[1], [0], [0], [1], [0, 0, 1, 1], [], []>} : vector<18x98xf32>, vector<98x8xf32>, vector<18x8xf32> -> vector<18x8xf32>
    %c4_39 = arith.constant 4 : index
    %c0_40 = arith.constant 0 : index
    %c0_41 = arith.constant 0 : index
    %40 = vector.load %arg5[%c4_39, %c0_40, %c0_41] : memref<9x8x16xf32, #tpu.memory_space<vmem>>, vector<1x8x16xf32>
    %41 = vector.shape_cast %40 : vector<1x8x16xf32> to vector<8x16xf32>
    %cst_42 = arith.constant dense<0.000000e+00> : vector<18x16xf32>
    %42 = tpu.matmul %39, %41, %cst_42 {dimension_numbers = #tpu.dot_dimension_numbers<[1], [0], [0], [1], [0, 0, 1, 1], [], []>} : vector<18x8xf32>, vector<8x16xf32>, vector<18x16xf32> -> vector<18x16xf32>
    %43 = arith.addf %36, %42 : vector<18x16xf32>
    %c5 = arith.constant 5 : index
    %c0_43 = arith.constant 0 : index
    %c0_44 = arith.constant 0 : index
    %44 = vector.load %arg4[%c5, %c0_43, %c0_44] : memref<9x18x98xf32, #tpu.memory_space<vmem>>, vector<1x18x98xf32>
    %45 = vector.shape_cast %44 : vector<1x18x98xf32> to vector<18x98xf32>
    %cst_45 = arith.constant dense<0.000000e+00> : vector<18x8xf32>
    %46 = tpu.matmul %45, %7, %cst_45 {dimension_numbers = #tpu.dot_dimension_numbers<[1], [0], [0], [1], [0, 0, 1, 1], [], []>} : vector<18x98xf32>, vector<98x8xf32>, vector<18x8xf32> -> vector<18x8xf32>
    %c5_46 = arith.constant 5 : index
    %c0_47 = arith.constant 0 : index
    %c0_48 = arith.constant 0 : index
    %47 = vector.load %arg5[%c5_46, %c0_47, %c0_48] : memref<9x8x16xf32, #tpu.memory_space<vmem>>, vector<1x8x16xf32>
    %48 = vector.shape_cast %47 : vector<1x8x16xf32> to vector<8x16xf32>
    %cst_49 = arith.constant dense<0.000000e+00> : vector<18x16xf32>
    %49 = tpu.matmul %46, %48, %cst_49 {dimension_numbers = #tpu.dot_dimension_numbers<[1], [0], [0], [1], [0, 0, 1, 1], [], []>} : vector<18x8xf32>, vector<8x16xf32>, vector<18x16xf32> -> vector<18x16xf32>
    %50 = arith.addf %43, %49 : vector<18x16xf32>
    %c6 = arith.constant 6 : index
    %c0_50 = arith.constant 0 : index
    %c0_51 = arith.constant 0 : index
    %51 = vector.load %arg4[%c6, %c0_50, %c0_51] : memref<9x18x98xf32, #tpu.memory_space<vmem>>, vector<1x18x98xf32>
    %52 = vector.shape_cast %51 : vector<1x18x98xf32> to vector<18x98xf32>
    %cst_52 = arith.constant dense<0.000000e+00> : vector<18x8xf32>
    %53 = tpu.matmul %52, %7, %cst_52 {dimension_numbers = #tpu.dot_dimension_numbers<[1], [0], [0], [1], [0, 0, 1, 1], [], []>} : vector<18x98xf32>, vector<98x8xf32>, vector<18x8xf32> -> vector<18x8xf32>
    %c6_53 = arith.constant 6 : index
    %c0_54 = arith.constant 0 : index
    %c0_55 = arith.constant 0 : index
    %54 = vector.load %arg5[%c6_53, %c0_54, %c0_55] : memref<9x8x16xf32, #tpu.memory_space<vmem>>, vector<1x8x16xf32>
    %55 = vector.shape_cast %54 : vector<1x8x16xf32> to vector<8x16xf32>
    %cst_56 = arith.constant dense<0.000000e+00> : vector<18x16xf32>
    %56 = tpu.matmul %53, %55, %cst_56 {dimension_numbers = #tpu.dot_dimension_numbers<[1], [0], [0], [1], [0, 0, 1, 1], [], []>} : vector<18x8xf32>, vector<8x16xf32>, vector<18x16xf32> -> vector<18x16xf32>
    %57 = arith.addf %50, %56 : vector<18x16xf32>
    %c7 = arith.constant 7 : index
    %c0_57 = arith.constant 0 : index
    %c0_58 = arith.constant 0 : index
    %58 = vector.load %arg4[%c7, %c0_57, %c0_58] : memref<9x18x98xf32, #tpu.memory_space<vmem>>, vector<1x18x98xf32>
    %59 = vector.shape_cast %58 : vector<1x18x98xf32> to vector<18x98xf32>
    %cst_59 = arith.constant dense<0.000000e+00> : vector<18x8xf32>
    %60 = tpu.matmul %59, %7, %cst_59 {dimension_numbers = #tpu.dot_dimension_numbers<[1], [0], [0], [1], [0, 0, 1, 1], [], []>} : vector<18x98xf32>, vector<98x8xf32>, vector<18x8xf32> -> vector<18x8xf32>
    %c7_60 = arith.constant 7 : index
    %c0_61 = arith.constant 0 : index
    %c0_62 = arith.constant 0 : index
    %61 = vector.load %arg5[%c7_60, %c0_61, %c0_62] : memref<9x8x16xf32, #tpu.memory_space<vmem>>, vector<1x8x16xf32>
    %62 = vector.shape_cast %61 : vector<1x8x16xf32> to vector<8x16xf32>
    %cst_63 = arith.constant dense<0.000000e+00> : vector<18x16xf32>
    %63 = tpu.matmul %60, %62, %cst_63 {dimension_numbers = #tpu.dot_dimension_numbers<[1], [0], [0], [1], [0, 0, 1, 1], [], []>} : vector<18x8xf32>, vector<8x16xf32>, vector<18x16xf32> -> vector<18x16xf32>
    %64 = arith.addf %57, %63 : vector<18x16xf32>
    %c8 = arith.constant 8 : index
    %c0_64 = arith.constant 0 : index
    %c0_65 = arith.constant 0 : index
    %65 = vector.load %arg4[%c8, %c0_64, %c0_65] : memref<9x18x98xf32, #tpu.memory_space<vmem>>, vector<1x18x98xf32>
    %66 = vector.shape_cast %65 : vector<1x18x98xf32> to vector<18x98xf32>
    %cst_66 = arith.constant dense<0.000000e+00> : vector<18x8xf32>
    %67 = tpu.matmul %66, %7, %cst_66 {dimension_numbers = #tpu.dot_dimension_numbers<[1], [0], [0], [1], [0, 0, 1, 1], [], []>} : vector<18x98xf32>, vector<98x8xf32>, vector<18x8xf32> -> vector<18x8xf32>
    %c8_67 = arith.constant 8 : index
    %c0_68 = arith.constant 0 : index
    %c0_69 = arith.constant 0 : index
    %68 = vector.load %arg5[%c8_67, %c0_68, %c0_69] : memref<9x8x16xf32, #tpu.memory_space<vmem>>, vector<1x8x16xf32>
    %69 = vector.shape_cast %68 : vector<1x8x16xf32> to vector<8x16xf32>
    %cst_70 = arith.constant dense<0.000000e+00> : vector<18x16xf32>
    %70 = tpu.matmul %67, %69, %cst_70 {dimension_numbers = #tpu.dot_dimension_numbers<[1], [0], [0], [1], [0, 0, 1, 1], [], []>} : vector<18x8xf32>, vector<8x16xf32>, vector<18x16xf32> -> vector<18x16xf32>
    %71 = arith.addf %64, %70 : vector<18x16xf32>
    %c0_71 = arith.constant 0 : index
    %c0_72 = arith.constant 0 : index
    %72 = vector.load %arg6[%c0_71, %c0_72] : memref<1x16xf32, #tpu.memory_space<vmem>>, vector<1x16xf32>
    %73 = vector.broadcast %72 : vector<1x16xf32> to vector<18x16xf32>
    %74 = arith.addf %71, %73 : vector<18x16xf32>
    %cst_73 = arith.constant 0.000000e+00 : f32
    %75 = vector.broadcast %cst_73 : f32 to vector<18x16xf32>
    %76 = arith.maximumf %74, %75 : vector<18x16xf32>
    %cst_74 = arith.constant 0.000000e+00 : f32
    %77 = vector.broadcast %cst_74 : f32 to vector<2x32xf32>
    %78 = vector.extract_strided_slice %76 {offsets = [0, 0], sizes = [2, 16], strides = [1, 1]} : vector<18x16xf32> to vector<2x16xf32>
    %c0_75 = arith.constant 0 : index
    %c0_76 = arith.constant 0 : index
    %c0_77 = arith.constant 0 : index
    %79 = vector.load %arg7[%c0_75, %c0_76, %c0_77] : memref<9x16x32xf32, #tpu.memory_space<vmem>>, vector<1x16x32xf32>
    %80 = vector.shape_cast %79 : vector<1x16x32xf32> to vector<16x32xf32>
    %cst_78 = arith.constant dense<0.000000e+00> : vector<2x32xf32>
    %81 = tpu.matmul %78, %80, %cst_78 {dimension_numbers = #tpu.dot_dimension_numbers<[1], [0], [0], [1], [0, 0, 1, 1], [], []>} : vector<2x16xf32>, vector<16x32xf32>, vector<2x32xf32> -> vector<2x32xf32>
    %82 = arith.addf %77, %81 : vector<2x32xf32>
    %83 = vector.extract_strided_slice %76 {offsets = [2, 0], sizes = [2, 16], strides = [1, 1]} : vector<18x16xf32> to vector<2x16xf32>
    %c1_79 = arith.constant 1 : index
    %c0_80 = arith.constant 0 : index
    %c0_81 = arith.constant 0 : index
    %84 = vector.load %arg7[%c1_79, %c0_80, %c0_81] : memref<9x16x32xf32, #tpu.memory_space<vmem>>, vector<1x16x32xf32>
    %85 = vector.shape_cast %84 : vector<1x16x32xf32> to vector<16x32xf32>
    %cst_82 = arith.constant dense<0.000000e+00> : vector<2x32xf32>
    %86 = tpu.matmul %83, %85, %cst_82 {dimension_numbers = #tpu.dot_dimension_numbers<[1], [0], [0], [1], [0, 0, 1, 1], [], []>} : vector<2x16xf32>, vector<16x32xf32>, vector<2x32xf32> -> vector<2x32xf32>
    %87 = arith.addf %82, %86 : vector<2x32xf32>
    %88 = vector.extract_strided_slice %76 {offsets = [4, 0], sizes = [2, 16], strides = [1, 1]} : vector<18x16xf32> to vector<2x16xf32>
    %c2_83 = arith.constant 2 : index
    %c0_84 = arith.constant 0 : index
    %c0_85 = arith.constant 0 : index
    %89 = vector.load %arg7[%c2_83, %c0_84, %c0_85] : memref<9x16x32xf32, #tpu.memory_space<vmem>>, vector<1x16x32xf32>
    %90 = vector.shape_cast %89 : vector<1x16x32xf32> to vector<16x32xf32>
    %cst_86 = arith.constant dense<0.000000e+00> : vector<2x32xf32>
    %91 = tpu.matmul %88, %90, %cst_86 {dimension_numbers = #tpu.dot_dimension_numbers<[1], [0], [0], [1], [0, 0, 1, 1], [], []>} : vector<2x16xf32>, vector<16x32xf32>, vector<2x32xf32> -> vector<2x32xf32>
    %92 = arith.addf %87, %91 : vector<2x32xf32>
    %93 = vector.extract_strided_slice %76 {offsets = [6, 0], sizes = [2, 16], strides = [1, 1]} : vector<18x16xf32> to vector<2x16xf32>
    %c3_87 = arith.constant 3 : index
    %c0_88 = arith.constant 0 : index
    %c0_89 = arith.constant 0 : index
    %94 = vector.load %arg7[%c3_87, %c0_88, %c0_89] : memref<9x16x32xf32, #tpu.memory_space<vmem>>, vector<1x16x32xf32>
    %95 = vector.shape_cast %94 : vector<1x16x32xf32> to vector<16x32xf32>
    %cst_90 = arith.constant dense<0.000000e+00> : vector<2x32xf32>
    %96 = tpu.matmul %93, %95, %cst_90 {dimension_numbers = #tpu.dot_dimension_numbers<[1], [0], [0], [1], [0, 0, 1, 1], [], []>} : vector<2x16xf32>, vector<16x32xf32>, vector<2x32xf32> -> vector<2x32xf32>
    %97 = arith.addf %92, %96 : vector<2x32xf32>
    %98 = vector.extract_strided_slice %76 {offsets = [8, 0], sizes = [2, 16], strides = [1, 1]} : vector<18x16xf32> to vector<2x16xf32>
    %c4_91 = arith.constant 4 : index
    %c0_92 = arith.constant 0 : index
    %c0_93 = arith.constant 0 : index
    %99 = vector.load %arg7[%c4_91, %c0_92, %c0_93] : memref<9x16x32xf32, #tpu.memory_space<vmem>>, vector<1x16x32xf32>
    %100 = vector.shape_cast %99 : vector<1x16x32xf32> to vector<16x32xf32>
    %cst_94 = arith.constant dense<0.000000e+00> : vector<2x32xf32>
    %101 = tpu.matmul %98, %100, %cst_94 {dimension_numbers = #tpu.dot_dimension_numbers<[1], [0], [0], [1], [0, 0, 1, 1], [], []>} : vector<2x16xf32>, vector<16x32xf32>, vector<2x32xf32> -> vector<2x32xf32>
    %102 = arith.addf %97, %101 : vector<2x32xf32>
    %103 = vector.extract_strided_slice %76 {offsets = [10, 0], sizes = [2, 16], strides = [1, 1]} : vector<18x16xf32> to vector<2x16xf32>
    %c5_95 = arith.constant 5 : index
    %c0_96 = arith.constant 0 : index
    %c0_97 = arith.constant 0 : index
    %104 = vector.load %arg7[%c5_95, %c0_96, %c0_97] : memref<9x16x32xf32, #tpu.memory_space<vmem>>, vector<1x16x32xf32>
    %105 = vector.shape_cast %104 : vector<1x16x32xf32> to vector<16x32xf32>
    %cst_98 = arith.constant dense<0.000000e+00> : vector<2x32xf32>
    %106 = tpu.matmul %103, %105, %cst_98 {dimension_numbers = #tpu.dot_dimension_numbers<[1], [0], [0], [1], [0, 0, 1, 1], [], []>} : vector<2x16xf32>, vector<16x32xf32>, vector<2x32xf32> -> vector<2x32xf32>
    %107 = arith.addf %102, %106 : vector<2x32xf32>
    %108 = vector.extract_strided_slice %76 {offsets = [12, 0], sizes = [2, 16], strides = [1, 1]} : vector<18x16xf32> to vector<2x16xf32>
    %c6_99 = arith.constant 6 : index
    %c0_100 = arith.constant 0 : index
    %c0_101 = arith.constant 0 : index
    %109 = vector.load %arg7[%c6_99, %c0_100, %c0_101] : memref<9x16x32xf32, #tpu.memory_space<vmem>>, vector<1x16x32xf32>
    %110 = vector.shape_cast %109 : vector<1x16x32xf32> to vector<16x32xf32>
    %cst_102 = arith.constant dense<0.000000e+00> : vector<2x32xf32>
    %111 = tpu.matmul %108, %110, %cst_102 {dimension_numbers = #tpu.dot_dimension_numbers<[1], [0], [0], [1], [0, 0, 1, 1], [], []>} : vector<2x16xf32>, vector<16x32xf32>, vector<2x32xf32> -> vector<2x32xf32>
    %112 = arith.addf %107, %111 : vector<2x32xf32>
    %113 = vector.extract_strided_slice %76 {offsets = [14, 0], sizes = [2, 16], strides = [1, 1]} : vector<18x16xf32> to vector<2x16xf32>
    %c7_103 = arith.constant 7 : index
    %c0_104 = arith.constant 0 : index
    %c0_105 = arith.constant 0 : index
    %114 = vector.load %arg7[%c7_103, %c0_104, %c0_105] : memref<9x16x32xf32, #tpu.memory_space<vmem>>, vector<1x16x32xf32>
    %115 = vector.shape_cast %114 : vector<1x16x32xf32> to vector<16x32xf32>
    %cst_106 = arith.constant dense<0.000000e+00> : vector<2x32xf32>
    %116 = tpu.matmul %113, %115, %cst_106 {dimension_numbers = #tpu.dot_dimension_numbers<[1], [0], [0], [1], [0, 0, 1, 1], [], []>} : vector<2x16xf32>, vector<16x32xf32>, vector<2x32xf32> -> vector<2x32xf32>
    %117 = arith.addf %112, %116 : vector<2x32xf32>
    %118 = vector.extract_strided_slice %76 {offsets = [16, 0], sizes = [2, 16], strides = [1, 1]} : vector<18x16xf32> to vector<2x16xf32>
    %c8_107 = arith.constant 8 : index
    %c0_108 = arith.constant 0 : index
    %c0_109 = arith.constant 0 : index
    %119 = vector.load %arg7[%c8_107, %c0_108, %c0_109] : memref<9x16x32xf32, #tpu.memory_space<vmem>>, vector<1x16x32xf32>
    %120 = vector.shape_cast %119 : vector<1x16x32xf32> to vector<16x32xf32>
    %cst_110 = arith.constant dense<0.000000e+00> : vector<2x32xf32>
    %121 = tpu.matmul %118, %120, %cst_110 {dimension_numbers = #tpu.dot_dimension_numbers<[1], [0], [0], [1], [0, 0, 1, 1], [], []>} : vector<2x16xf32>, vector<16x32xf32>, vector<2x32xf32> -> vector<2x32xf32>
    %122 = arith.addf %117, %121 : vector<2x32xf32>
    %c0_111 = arith.constant 0 : index
    %c0_112 = arith.constant 0 : index
    %123 = vector.load %arg8[%c0_111, %c0_112] : memref<1x32xf32, #tpu.memory_space<vmem>>, vector<1x32xf32>
    %124 = vector.broadcast %123 : vector<1x32xf32> to vector<2x32xf32>
    %125 = arith.addf %122, %124 : vector<2x32xf32>
    %cst_113 = arith.constant 0.000000e+00 : f32
    %126 = vector.broadcast %cst_113 : f32 to vector<2x32xf32>
    %127 = arith.maximumf %125, %126 : vector<2x32xf32>
    %c0_114 = arith.constant 0 : index
    %c0_115 = arith.constant 0 : index
    %128 = vector.load %arg9[%c0_114, %c0_115] : memref<32x6xf32, #tpu.memory_space<vmem>>, vector<32x6xf32>
    %cst_116 = arith.constant dense<0.000000e+00> : vector<2x6xf32>
    %129 = tpu.matmul %127, %128, %cst_116 {dimension_numbers = #tpu.dot_dimension_numbers<[1], [0], [0], [1], [0, 0, 1, 1], [], []>} : vector<2x32xf32>, vector<32x6xf32>, vector<2x6xf32> -> vector<2x6xf32>
    %c0_117 = arith.constant 0 : index
    %c0_118 = arith.constant 0 : index
    %130 = vector.load %arg10[%c0_117, %c0_118] : memref<1x6xf32, #tpu.memory_space<vmem>>, vector<1x6xf32>
    %131 = vector.broadcast %130 : vector<1x6xf32> to vector<2x6xf32>
    %132 = arith.addf %129, %131 : vector<2x6xf32>
    %c0_119 = arith.constant 0 : index
    %c0_120 = arith.constant 0 : index
    %133 = vector.load %arg11[%c0_119, %c0_120] : memref<2x6xf32, #tpu.memory_space<vmem>>, vector<2x6xf32>
    tpu.vector_store %arg11[%c0_119, %c0_120], %132 {strides = array<i32>} : memref<2x6xf32, #tpu.memory_space<vmem>>, vector<2x6xf32>,
    return
  }
  func.func @transform_0(%arg0: i32) -> (i32, i32) {
    %c0_i32 = arith.constant 0 : i32
    %c0_i32_0 = arith.constant 0 : i32
    %c0_i32_1 = arith.constant 0 : i32
    return %c0_i32, %c0_i32_0 : i32, i32
  }
  func.func @transform_1(%arg0: i32) -> (i32, i32) {
    %c0_i32 = arith.constant 0 : i32
    %c0_i32_0 = arith.constant 0 : i32
    %c0_i32_1 = arith.constant 0 : i32
    return %c0_i32, %c0_i32_0 : i32, i32
  }
  func.func @transform_2(%arg0: i32) -> (i32, i32) {
    %c0_i32 = arith.constant 0 : i32
    %c0_i32_0 = arith.constant 0 : i32
    %c0_i32_1 = arith.constant 0 : i32
    return %c0_i32, %c0_i32_0 : i32, i32
  }
  func.func @transform_3(%arg0: i32) -> (i32, i32, i32) {
    %c0_i32 = arith.constant 0 : i32
    %c0_i32_0 = arith.constant 0 : i32
    %c0_i32_1 = arith.constant 0 : i32
    %c0_i32_2 = arith.constant 0 : i32
    return %c0_i32, %c0_i32_0, %c0_i32_1 : i32, i32, i32
  }
  func.func @transform_4(%arg0: i32) -> (i32, i32, i32) {
    %c0_i32 = arith.constant 0 : i32
    %c0_i32_0 = arith.constant 0 : i32
    %c0_i32_1 = arith.constant 0 : i32
    %c0_i32_2 = arith.constant 0 : i32
    return %c0_i32, %c0_i32_0, %c0_i32_1 : i32, i32, i32
  }
  func.func @transform_5(%arg0: i32) -> (i32, i32) {
    %c0_i32 = arith.constant 0 : i32
    %c0_i32_0 = arith.constant 0 : i32
    %c0_i32_1 = arith.constant 0 : i32
    return %c0_i32, %c0_i32_0 : i32, i32
  }
  func.func @transform_6(%arg0: i32) -> (i32, i32, i32) {
    %c0_i32 = arith.constant 0 : i32
    %c0_i32_0 = arith.constant 0 : i32
    %c0_i32_1 = arith.constant 0 : i32
    %c0_i32_2 = arith.constant 0 : i32
    return %c0_i32, %c0_i32_0, %c0_i32_1 : i32, i32, i32
  }
  func.func @transform_7(%arg0: i32) -> (i32, i32) {
    %c0_i32 = arith.constant 0 : i32
    %c0_i32_0 = arith.constant 0 : i32
    %c0_i32_1 = arith.constant 0 : i32
    return %c0_i32, %c0_i32_0 : i32, i32
  }
  func.func @transform_8(%arg0: i32) -> (i32, i32) {
    %c0_i32 = arith.constant 0 : i32
    %c0_i32_0 = arith.constant 0 : i32
    %c0_i32_1 = arith.constant 0 : i32
    return %c0_i32, %c0_i32_0 : i32, i32
  }
  func.func @transform_9(%arg0: i32) -> (i32, i32) {
    %c0_i32 = arith.constant 0 : i32
    %c0_i32_0 = arith.constant 0 : i32
    %c0_i32_1 = arith.constant 0 : i32
    return %c0_i32, %c0_i32_0 : i32, i32
  }
  func.func @transform_10(%arg0: i32) -> (i32, i32) {
    %c0_i32 = arith.constant 0 : i32
    %c0_i32_0 = arith.constant 0 : i32
    %c0_i32_1 = arith.constant 0 : i32
    return %c0_i32, %c0_i32_0 : i32, i32
  }
}

</mosaic_0001>

<bundles_post_ra>
// kernel: _lambda_.1
= control target key start
LH: loop header
LB: loop body
LE: loop exit
PB: predicated region body
PF: predicated region fallthrough
CT: control target
= control target key end

     0   :  { %vm101_vm0 = vcmask 1043456   ;;  %v3674_v1 = vmov 0.0   ;;  %vm3675_vm1 = vmmov 0   ;;  %s4521_s0 = inlined_call_operand.vmem [shape: f32[98,36], index: 0, kind: input, shape index: {}]   ;;  %s4522_s1 = inlined_call_operand.vmem [shape: f32[36,8], index: 1, kind: input, shape index: {}]   ;;  %s4523_s2 = inlined_call_operand.vmem [shape: f32[1,8], index: 2, kind: input, shape index: {}]   ;;  %s4524_s3 = inlined_call_operand.vmem [shape: f32[9,18,98], index: 3, kind: input, shape index: {}]   ;;  %s4525_s4 = inlined_call_operand.vmem [shape: f32[9,8,16], index: 4, kind: input, shape index: {}]   ;;  %s4526_s5 = inlined_call_operand.vmem [shape: f32[1,16], index: 5, kind: input, shape index: {}]   ;;  %s4527_s6 = inlined_call_operand.vmem [shape: f32[9,16,32], index: 6, kind: input, shape index: {}]   ;;  %s4528_s7 = inlined_call_operand.vmem [shape: f32[1,32], index: 7, kind: input, shape index: {}]   ;;  %s4529_s8 = inlined_call_operand.vmem [shape: f32[32,6], index: 8, kind: input, shape index: {}]   ;;  %s4530_s9 = inlined_call_operand.vmem [shape: f32[1,6], index: 9, kind: input, shape index: {}]   ;;  %s4531_s10 = inlined_call_operand.hbm [shape: f32[2,6], index: 10, kind: output, shape index: {}]  }
   0x1   :  { %v53_v0 = vld [vmem:[%s4522_s1 + $0x20] sm:$0xf]  ;;  %3112 = vmatprep.subr.mxu0 %v3674_v1  ;;  %v52_v2 = vld [vmem:[%s4522_s1 + $0x18] sm:$0xff]  ;;  %3161 = vmatprep.subr.mxu1 %v3674_v1  ;;  %v51_v3 = vld [vmem:[%s4522_s1 + $0x10] sm:$0xff] }
   0x2   :  { %3113 = vmatpush3.msk.msra.mxu0 %vm101_vm0, %v53_v0  ;;  %3122 = vmatprep.mubr.msk.f32.mxu0 %vm3675_vm1, %v3674_v1  ;;  %v50_v4 = vld [vmem:[%s4522_s1 + $0x8] sm:$0xff] }
   0x3   :  { %3114 = vmatprep.subr.mxu0 %v3674_v1  ;;  %3187 = vmatprep.mubr.msk.f32.mxu1 %vm3675_vm1, %v3674_v1 }
   0x4   :  { %3115 = vmatpush3.msra.mxu0 %v52_v2 }
   0x5   :  { %3116 = vmatprep.subr.mxu0 %v3674_v1 }
   0x6   :  { %3117 = vmatpush3.msra.mxu0 %v51_v3 }
   0x7   :  { %15 = vsyncpa [#allocation3], 0  ;;  %3118 = vmatprep.subr.mxu0 %v3674_v1  ;;  %v49_v5 = vld [vmem:[%s4522_s1] sm:$0xff]  ;;  %vm61_vm2 = vcmask 293888   ;;  %v37_v7 = vld [vmem:[%s4521_s0 + $0x8] sm:$0xff]  ;;  %vm261_vm3 = vcmask 1041408  }
   0x8   :  { %3119 = vmatpush3.msra.mxu0 %v50_v4  ;;  %v36_v6 = vld [vmem:[%s4521_s0] sm:$0xff]  ;;  %v38_v8 = vld [vmem:[%s4521_s0 + $0x10] sm:$0xff]  ;;  %v39_v9 = vld [vmem:[%s4521_s0 + $0x18] sm:$0xff]  ;;  %vm251_vm4 = vcmask 801792   ;;  %vm441_vm5 = vcmask 64512   ;;  %vm1949_vm6 = vcmask 130048  }
   0x9   :  { %3120 = vmatprep.subr.mxu0 %v3674_v1  ;;  %v40_v10 = vld [vmem:[%s4521_s0 + $0x20] sm:$0xff]  ;;  %v41_v11 = vld [vmem:[%s4521_s0 + $0x28] sm:$0xff]  ;;  %v42_v12 = vld [vmem:[%s4521_s0 + $0x30] sm:$0xff]  ;;  %vm2653_vm7 = vcmask 261120   ;;  %s3676_s28 = smov [#allocation2]   ;;  %vm2727_vm8 = vcmask 41984  }
   0xa   :  { %3121 = vmatpush3.msra.mxu0 %v49_v5  ;;  %v43_v13 = vld [vmem:[%s4521_s0 + $0x38] sm:$0xff]  ;;  %v44_v14 = vld [vmem:[%s4521_s0 + $0x40] sm:$0xff]  ;;  %v45_v15 = vld [vmem:[%s4521_s0 + $0x48] sm:$0xff] }
   0xb   :  { %3123 = vmatmul.mubr.msk.f32.vlgmr.msra.gmra.mxu0 %vm61_vm2, %v36_v6  ;;  %3231 = vmatprep.subr.mxu0 %v3674_v1  ;;  %v46_v16 = vld [vmem:[%s4521_s0 + $0x50] sm:$0xff]  ;;  %v47_v17 = vld [vmem:[%s4521_s0 + $0x58] sm:$0xff]  ;;  %v48_v18 = vld [vmem:[%s4521_s0 + $0x60] sm:$0x3]  ;;  %s2735_s0 = sshll.u32 %s3676_s28, 4  ;;  %s2736_s0 = int_to_ptr.vmem [resolvable:$true] %s2735_s0 }
   0xc   :  { %3125 = vmatprep.mubr.msk.f32.mxu0 %vm3675_vm1, %v3674_v1  ;;  %v2769_v19 = vld [vmem:[%s4525_s4 + $0x8] sm:$0xff]  ;;  %v2743_v44 = vld [vmem:[%s4523_s2] ss:$0 sm:$0xff]  ;;  %s3652_s29 = scalar_lea.vmem %s2736_s0, 32  ;;  %p3657_p1 = scmp.lt.s32.totalorder %s2736_s0, %s2736_s0 }
   0xd   :  { %3232 = vmatpush3.msra.mxu0 %v2769_v19  ;;  %p3653_p0 = scmp.ne.s32.totalorder %s2736_s0, %s3652_s29  ;;  %p3658_p2 = scmp.lt.s32.totalorder %s3652_s29, %s3652_s29 }
   0xe   :  { %3253 = vmatprep.subr.mxu0 %v3674_v1 }
   0xf   :  { %3126 = vmatmul.mubr.msk.f32.gmra.mxu0 %vm61_vm2, %v37_v7  ;;  %p3659_p3 = por %p3658_p2, %p3657_p1 }
  0x10   :  { %3128 = vmatprep.mubr.msk.f32.mxu0 %vm3675_vm1, %v3674_v1 }
  0x11   :  { %p3660_p4 = pnand %p3659_p3, %p3653_p0 }
  0x13   :  { %3129 = vmatmul.mubr.msk.f32.gmra.mxu0 %vm61_vm2, %v38_v8 }
  0x14   :  { %3131 = vmatprep.mubr.msk.f32.mxu0 %vm3675_vm1, %v3674_v1 }
  0x17   :  { %3132 = vmatmul.mubr.msk.f32.gmra.mxu0 %vm61_vm2, %v39_v9 }
  0x18   :  { %3134 = vmatprep.mubr.msk.f32.mxu0 %vm3675_vm1, %v3674_v1 }
  0x1b   :  { %3135 = vmatmul.mubr.msk.f32.gmra.mxu0 %vm61_vm2, %v40_v10  ;;  %v248_v10 = vld [vmem:[%s4524_s3] sm:$0xff] }
  0x1c   :  { %3137 = vmatprep.mubr.msk.f32.mxu0 %vm3675_vm1, %v3674_v1 }
  0x1f   :  { %3138 = vmatmul.mubr.msk.f32.gmra.mxu0 %vm61_vm2, %v41_v11  ;;  %v249_v11 = vld [vmem:[%s4524_s3 + $0x8] sm:$0xff] }
  0x20   :  { %3140 = vmatprep.mubr.msk.f32.mxu0 %vm3675_vm1, %v3674_v1 }
  0x23   :  { %3141 = vmatmul.mubr.msk.f32.gmra.mxu0 %vm61_vm2, %v42_v12  ;;  %v250_v12 = vld [vmem:[%s4524_s3 + $0x10] sm:$0x3] }
  0x24   :  { %3143 = vmatprep.mubr.msk.f32.mxu0 %vm3675_vm1, %v3674_v1 }
  0x27   :  { %3144 = vmatmul.mubr.msk.f32.gmra.mxu0 %vm61_vm2, %v43_v13  ;;  %v2762_v13 = vld [vmem:[%s4524_s3 + $0x18] sm:$0xff] }
  0x28   :  { %3146 = vmatprep.mubr.msk.f32.mxu0 %vm3675_vm1, %v3674_v1 }
  0x2b   :  { %3147 = vmatmul.mubr.msk.f32.gmra.mxu0 %vm61_vm2, %v44_v14  ;;  %v2763_v14 = vld [vmem:[%s4524_s3 + $0x20] sm:$0xff] }
  0x2c   :  { %3149 = vmatprep.mubr.msk.f32.mxu0 %vm3675_vm1, %v3674_v1 }
  0x2f   :  { %3150 = vmatmul.mubr.msk.f32.gmra.mxu0 %vm61_vm2, %v45_v15  ;;  %v2764_v15 = vld [vmem:[%s4524_s3 + $0x28] sm:$0x3] }
  0x30   :  { %3152 = vmatprep.mubr.msk.f32.mxu0 %vm3675_vm1, %v3674_v1 }
  0x33   :  { %3153 = vmatmul.mubr.msk.f32.gmra.mxu0 %vm61_vm2, %v46_v16  ;;  %v345_v16 = vld [vmem:[%s4525_s4] sm:$0xff] }
  0x34   :  { %3155 = vmatprep.mubr.msk.f32.mxu0 %vm3675_vm1, %v3674_v1 }
  0x37   :  { %3156 = vmatmul.mubr.msk.f32.gmra.mxu0 %vm61_vm2, %v47_v17 }
  0x38   :  { %3158 = vmatprep.mubr.msk.f32.mxu0 %vm3675_vm1, %v3674_v1 }
  0x3b   :  { %3159 = vmatmul.mubr.msk.f32.gmra.mxu0 %vm61_vm2, %v48_v18 }
  0x3c   :  { %3233 = vmatprep.mubr.msk.f32.mxu0 %vm3675_vm1, %v3674_v1 }
  0xcb   :  { %v3840_v20 = vpop.f32.mrf.mxu0 }
  0xcc   :  { %v172_v6 = vadd.f32 %v2743_v44, %v3840_v20 }
  0xcd   :  { %v3124_v21 = vpop.f32.mrf.mxu0 }
  0xce   :  { %v3893_v9 = vmax.f32 %v172_v6, 0.0 }
  0xcf   :  { %v176_v22 = vpop.f32.mrf.mxu0 }
  0xd0   :  { %v177_v4 = vadd.f32 %v2743_v44, %v176_v22 }
  0xd1   :  { %v3127_v23 = vpop.f32.mrf.mxu0 }
  0xd2   :  { %v3889_v8 = vmax.f32 %v177_v4, 0.0 }
  0xd3   :  { %v181_v24 = vpop.f32.mrf.mxu0 }
  0xd4   :  { %v182_v2 = vadd.f32 %v2743_v44, %v181_v24 }
  0xd5   :  { %v3130_v25 = vpop.f32.mrf.mxu0 }
  0xd6   :  { %v3885_v7 = vmax.f32 %v182_v2, 0.0  ;;  %v2794_v2 = vld [vmem:[%s4525_s4 + $0x18] sm:$0xff] }
  0xd7   :  { %v186_v26 = vpop.f32.mrf.mxu0 }
  0xd8   :  { %v187_v63 = vadd.f32 %v2743_v44, %v186_v26 }
  0xd9   :  { %v3133_v27 = vpop.f32.mrf.mxu0 }
  0xda   :  { %v3880_v5 = vmax.f32 %v187_v63, 0.0  ;;  %v2789_v63 = vld [vmem:[%s4524_s3 + $0x58] sm:$0x3] }
  0xdb   :  { %v191_v28 = vpop.f32.mrf.mxu0 }
  0xdc   :  { %v192_v61 = vadd.f32 %v2743_v44, %v191_v28 }
  0xdd   :  { %v3136_v29 = vpop.f32.mrf.mxu0 }
  0xde   :  { %v3876_v3 = vmax.f32 %v192_v61, 0.0  ;;  %v2776_v29 = vld [vmem:[%s4524_s3 + $0x30] sm:$0xff] }
  0xdf   :  { %v196_v30 = vpop.f32.mrf.mxu0  ;;  %v2788_v61 = vld [vmem:[%s4524_s3 + $0x50] sm:$0xff] }
  0xe0   :  { %v197_v59 = vadd.f32 %v2743_v44, %v196_v30  ;;  %v2777_v30 = vld [vmem:[%s4524_s3 + $0x38] sm:$0xff] }
  0xe1   :  { %v3139_v31 = vpop.f32.mrf.mxu0 }
  0xe2   :  { %v3872_v0 = vmax.f32 %v197_v59, 0.0  ;;  %v2778_v31 = vld [vmem:[%s4524_s3 + $0x40] sm:$0x3]  ;;  %v2787_v59 = vld [vmem:[%s4524_s3 + $0x48] sm:$0xff] }
  0xe3   :  { %v201_v32 = vpop.f32.mrf.mxu0 }
  0xe4   :  { %v202_v57 = vadd.f32 %v2743_v44, %v201_v32  ;;  %v2783_v32 = vld [vmem:[%s4525_s4 + $0x10] sm:$0xff] }
  0xe5   :  { %v3142_v33 = vpop.f32.mrf.mxu0 }
  0xe6   :  { %v3868_v62 = vmax.f32 %v202_v57, 0.0 }
  0xe7   :  { %v206_v34 = vpop.f32.mrf.mxu0 }
  0xe8   :  { %v207_v55 = vadd.f32 %v2743_v44, %v206_v34 }
  0xe9   :  { %v3145_v35 = vpop.f32.mrf.mxu0 }
  0xea   :  { %v3864_v60 = vmax.f32 %v207_v55, 0.0 }
  0xeb   :  { %v211_v36 = vpop.f32.mrf.mxu0 }
  0xec   :  { %v212_v53 = vadd.f32 %v2743_v44, %v211_v36 }
  0xed   :  { %v3148_v37 = vpop.f32.mrf.mxu0 }
  0xee   :  { %v3860_v58 = vmax.f32 %v212_v53, 0.0 }
  0xef   :  { %v216_v38 = vpop.f32.mrf.mxu0 }
  0xf0   :  { %v217_v51 = vadd.f32 %v2743_v44, %v216_v38 }
  0xf1   :  { %v3151_v39 = vpop.f32.mrf.mxu0 }
  0xf2   :  { %v3856_v56 = vmax.f32 %v217_v51, 0.0 }
  0xf3   :  { %v221_v40 = vpop.f32.mrf.mxu0 }
  0xf4   :  { %v222_v49 = vadd.f32 %v2743_v44, %v221_v40 }
  0xf5   :  { %v3154_v41 = vpop.f32.mrf.mxu0 }
  0xf6   :  { %v3852_v54 = vmax.f32 %v222_v49, 0.0 }
  0xf7   :  { %v226_v42 = vpop.f32.mrf.mxu0 }
  0xf8   :  { %v227_v46 = vadd.f32 %v2743_v44, %v226_v42 }
  0xf9   :  { %v3157_v43 = vpop.f32.mrf.mxu0 }
  0xfa   :  { %v3847_v52 = vmax.f32 %v227_v46, 0.0 }
  0xfb   :  { %v231_v45 = vpop.f32.mrf.mxu0 }
  0xfc   :  { %v232_v47 = vadd.f32 %v2743_v44, %v231_v45 }
  0xfd   :  { %v3160_v48 = vpop.f32.mrf.mxu0 }
  0xfe   :  { %v3845_v50 = vmax.f32 %v232_v47, 0.0 }
 0x100   :  { %3162 = vmatpush3.msk.msra.mxu1 %vm261_vm3, %v3845_v50 }
 0x101   :  { %3163 = vmatprep.subr.mxu1 %v3674_v1 }
 0x102   :  { %3164 = vmatpush3.msra.mxu1 %v3847_v52 }
 0x103   :  { %3165 = vmatprep.subr.mxu1 %v3674_v1 }
 0x104   :  { %3166 = vmatpush3.msra.mxu1 %v3852_v54 }
 0x105   :  { %3167 = vmatprep.subr.mxu1 %v3674_v1 }
 0x106   :  { %3168 = vmatpush3.msra.mxu1 %v3856_v56 }
 0x107   :  { %3169 = vmatprep.subr.mxu1 %v3674_v1 }
 0x108   :  { %3170 = vmatpush3.msra.mxu1 %v3860_v58 }
 0x109   :  { %3171 = vmatprep.subr.mxu1 %v3674_v1 }
 0x10a   :  { %3172 = vmatpush3.msra.mxu1 %v3864_v60 }
 0x10b   :  { %3173 = vmatprep.subr.mxu1 %v3674_v1 }
 0x10c   :  { %3174 = vmatpush3.msra.mxu1 %v3868_v62 }
 0x10d   :  { %3175 = vmatprep.subr.mxu1 %v3674_v1 }
 0x10e   :  { %3176 = vmatpush3.msra.mxu1 %v3872_v0 }
 0x10f   :  { %3177 = vmatprep.subr.mxu1 %v3674_v1 }
 0x110   :  { %3178 = vmatpush3.msra.mxu1 %v3876_v3 }
 0x111   :  { %3179 = vmatprep.subr.mxu1 %v3674_v1 }
 0x112   :  { %3180 = vmatpush3.msra.mxu1 %v3880_v5 }
 0x113   :  { %3181 = vmatprep.subr.mxu1 %v3674_v1 }
 0x114   :  { %3182 = vmatpush3.msra.mxu1 %v3885_v7 }
 0x115   :  { %3183 = vmatprep.subr.mxu1 %v3674_v1 }
 0x116   :  { %3184 = vmatpush3.msra.mxu1 %v3889_v8 }
 0x117   :  { %3185 = vmatprep.subr.mxu1 %v3674_v1 }
 0x118   :  { %3186 = vmatpush3.msra.mxu1 %v3893_v9 }
 0x119   :  { %3188 = vmatmul.mubr.msk.f32.vlgmr.msra.gmra.mxu1 %vm251_vm4, %v248_v10  ;;  %3196 = vmatprep.subr.mxu1 %v3674_v1 }
 0x11a   :  { %3197 = vmatpush3.msk.msra.mxu1 %vm261_vm3, %v3845_v50  ;;  %3190 = vmatprep.mubr.msk.f32.mxu1 %vm3675_vm1, %v3674_v1 }
 0x11b   :  { %3198 = vmatprep.subr.mxu1 %v3674_v1 }
 0x11c   :  { %3199 = vmatpush3.msra.mxu1 %v3847_v52 }
 0x11d   :  { %3200 = vmatprep.subr.mxu1 %v3674_v1  ;;  %3191 = vmatmul.mubr.msk.f32.gmra.mxu1 %vm251_vm4, %v249_v11 }
 0x11e   :  { %3201 = vmatpush3.msra.mxu1 %v3852_v54  ;;  %3193 = vmatprep.mubr.msk.f32.mxu1 %vm3675_vm1, %v3674_v1 }
 0x11f   :  { %3202 = vmatprep.subr.mxu1 %v3674_v1 }
 0x120   :  { %3203 = vmatpush3.msra.mxu1 %v3856_v56 }
 0x121   :  { %3204 = vmatprep.subr.mxu1 %v3674_v1  ;;  %3194 = vmatmul.mubr.msk.f32.gmra.mxu1 %vm251_vm4, %v250_v12 }
 0x122   :  { %3205 = vmatpush3.msra.mxu1 %v3860_v58  ;;  %3222 = vmatprep.mubr.msk.f32.mxu1 %vm3675_vm1, %v3674_v1 }
 0x123   :  { %3206 = vmatprep.subr.mxu1 %v3674_v1 }
 0x124   :  { %3207 = vmatpush3.msra.mxu1 %v3864_v60 }
 0x125   :  { %3208 = vmatprep.subr.mxu1 %v3674_v1 }
 0x126   :  { %3209 = vmatpush3.msra.mxu1 %v3868_v62 }
 0x127   :  { %3210 = vmatprep.subr.mxu1 %v3674_v1 }
 0x128   :  { %3211 = vmatpush3.msra.mxu1 %v3872_v0 }
 0x129   :  { %3212 = vmatprep.subr.mxu1 %v3674_v1 }
 0x12a   :  { %3213 = vmatpush3.msra.mxu1 %v3876_v3 }
 0x12b   :  { %3214 = vmatprep.subr.mxu1 %v3674_v1 }
 0x12c   :  { %3215 = vmatpush3.msra.mxu1 %v3880_v5 }
 0x12d   :  { %3216 = vmatprep.subr.mxu1 %v3674_v1 }
 0x12e   :  { %3217 = vmatpush3.msra.mxu1 %v3885_v7 }
 0x12f   :  { %3218 = vmatprep.subr.mxu1 %v3674_v1 }
 0x130   :  { %3219 = vmatpush3.msra.mxu1 %v3889_v8 }
 0x131   :  { %3220 = vmatprep.subr.mxu1 %v3674_v1 }
 0x132   :  { %3221 = vmatpush3.msra.mxu1 %v3893_v9 }
 0x133   :  { %3223 = vmatmul.mubr.msk.f32.vlgmr.msra.gmra.mxu1 %vm251_vm4, %v2762_v13  ;;  %3242 = vmatprep.subr.mxu1 %v3674_v1 }
 0x134   :  { %3225 = vmatprep.mubr.msk.f32.mxu1 %vm3675_vm1, %v3674_v1  ;;  %3243 = vmatpush3.msra.mxu1 %v345_v16 }
 0x135   :  { %3288 = vmatprep.subr.mxu1 %v3674_v1 }
 0x137   :  { %3226 = vmatmul.mubr.msk.f32.gmra.mxu1 %vm251_vm4, %v2763_v14 }
 0x138   :  { %3228 = vmatprep.mubr.msk.f32.mxu1 %vm3675_vm1, %v3674_v1 }
 0x13b   :  { %3229 = vmatmul.mubr.msk.f32.gmra.mxu1 %vm251_vm4, %v2764_v15 }
 0x13c   :  { %3244 = vmatprep.mubr.msk.f32.mxu1 %vm3675_vm1, %v3674_v1 }
 0x1d9   :  { %v331_v17 = vpop.f32.mrf.mxu1 }
 0x1da   :  { %3245 = vmatmul.mubr.msk.f32.vlgmr.msra.gmra.mxu1 %vm441_vm5, %v331_v17 }
 0x1db   :  { %v3189_v18 = vpop.f32.mrf.mxu1  ;;  %3247 = vmatprep.mubr.msk.f32.mxu1 %vm3675_vm1, %v3674_v1  ;;  %3289 = vmatpush3.msra.mxu1 %v2783_v32 }
 0x1dc   :  { %3299 = vmatprep.subr.mxu1 %v3674_v1 }
 0x1dd   :  { %v336_v19 = vpop.f32.mrf.mxu1 }
 0x1de   :  { %3248 = vmatmul.mubr.msk.f32.gmra.mxu1 %vm441_vm5, %v336_v19 }
 0x1df   :  { %v3192_v20 = vpop.f32.mrf.mxu1  ;;  %3250 = vmatprep.mubr.msk.f32.mxu1 %vm3675_vm1, %v3674_v1 }
 0x1e1   :  { %v341_v21 = vpop.f32.mrf.mxu1 }
 0x1e2   :  { %3251 = vmatmul.mubr.msk.f32.gmra.mxu1 %vm441_vm5, %v341_v21 }
 0x1e3   :  { %v3195_v22 = vpop.f32.mrf.mxu1  ;;  %3290 = vmatprep.mubr.msk.f32.mxu1 %vm3675_vm1, %v3674_v1 }
 0x1f3   :  { %v425_v23 = vpop.f32.mrf.mxu1 }
 0x1f4   :  { %3234 = vmatmul.mubr.msk.f32.vlgmr.msra.gmra.mxu0 %vm441_vm5, %v425_v23  ;;  %v2798_v23 = vld [vmem:[%s4524_s3 + $0x60] sm:$0xff] }
 0x1f5   :  { %3254 = vmatpush3.msk.msra.mxu0 %vm261_vm3, %v3845_v50  ;;  %v3224_v24 = vpop.f32.mrf.mxu1  ;;  %3236 = vmatprep.mubr.msk.f32.mxu0 %vm3675_vm1, %v3674_v1 }
 0x1f6   :  { %3255 = vmatprep.subr.mxu0 %v3674_v1  ;;  %v2799_v24 = vld [vmem:[%s4524_s3 + $0x68] sm:$0xff] }
 0x1f7   :  { %3256 = vmatpush3.msra.mxu0 %v3847_v52  ;;  %v430_v25 = vpop.f32.mrf.mxu1 }
 0x1f8   :  { %3257 = vmatprep.subr.mxu0 %v3674_v1  ;;  %3237 = vmatmul.mubr.msk.f32.gmra.mxu0 %vm441_vm5, %v430_v25  ;;  %v2800_v25 = vld [vmem:[%s4524_s3 + $0x70] sm:$0x3] }
 0x1f9   :  { %3258 = vmatpush3.msra.mxu0 %v3852_v54  ;;  %v3227_v26 = vpop.f32.mrf.mxu1  ;;  %3239 = vmatprep.mubr.msk.f32.mxu0 %vm3675_vm1, %v3674_v1 }
 0x1fa   :  { %3259 = vmatprep.subr.mxu0 %v3674_v1  ;;  %v2805_v26 = vld [vmem:[%s4525_s4 + $0x20] sm:$0xff] }
 0x1fb   :  { %3260 = vmatpush3.msra.mxu0 %v3856_v56  ;;  %v435_v27 = vpop.f32.mrf.mxu1 }
 0x1fc   :  { %3261 = vmatprep.subr.mxu0 %v3674_v1  ;;  %3240 = vmatmul.mubr.msk.f32.gmra.mxu0 %vm441_vm5, %v435_v27 }
 0x1fd   :  { %3262 = vmatpush3.msra.mxu0 %v3860_v58  ;;  %v3230_v28 = vpop.f32.mrf.mxu1  ;;  %3279 = vmatprep.mubr.msk.f32.mxu0 %vm3675_vm1, %v3674_v1 }
 0x1fe   :  { %3263 = vmatprep.subr.mxu0 %v3674_v1 }
 0x1ff   :  { %3264 = vmatpush3.msra.mxu0 %v3864_v60 }
 0x200   :  { %3265 = vmatprep.subr.mxu0 %v3674_v1 }
 0x201   :  { %3266 = vmatpush3.msra.mxu0 %v3868_v62 }
 0x202   :  { %3267 = vmatprep.subr.mxu0 %v3674_v1 }
 0x203   :  { %3268 = vmatpush3.msra.mxu0 %v3872_v0 }
 0x204   :  { %3269 = vmatprep.subr.mxu0 %v3674_v1 }
 0x205   :  { %3270 = vmatpush3.msra.mxu0 %v3876_v3 }
 0x206   :  { %3271 = vmatprep.subr.mxu0 %v3674_v1 }
 0x207   :  { %3272 = vmatpush3.msra.mxu0 %v3880_v5 }
 0x208   :  { %3273 = vmatprep.subr.mxu0 %v3674_v1 }
 0x209   :  { %3274 = vmatpush3.msra.mxu0 %v3885_v7 }
 0x20a   :  { %3275 = vmatprep.subr.mxu0 %v3674_v1 }
 0x20b   :  { %3276 = vmatpush3.msra.mxu0 %v3889_v8 }
 0x20c   :  { %3277 = vmatprep.subr.mxu0 %v3674_v1 }
 0x20d   :  { %3278 = vmatpush3.msra.mxu0 %v3893_v9 }
 0x20e   :  { %3280 = vmatmul.mubr.msk.f32.vlgmr.msra.gmra.mxu0 %vm251_vm4, %v2776_v29  ;;  %3334 = vmatprep.subr.mxu0 %v3674_v1 }
 0x20f   :  { %3282 = vmatprep.mubr.msk.f32.mxu0 %vm3675_vm1, %v3674_v1  ;;  %3335 = vmatpush3.msra.mxu0 %v2794_v2 }
 0x210   :  { %3345 = vmatprep.subr.mxu0 %v3674_v1 }
 0x212   :  { %3283 = vmatmul.mubr.msk.f32.gmra.mxu0 %vm251_vm4, %v2777_v30 }
 0x213   :  { %3285 = vmatprep.mubr.msk.f32.mxu0 %vm3675_vm1, %v3674_v1 }
 0x216   :  { %3286 = vmatmul.mubr.msk.f32.gmra.mxu0 %vm251_vm4, %v2778_v31 }
 0x217   :  { %3336 = vmatprep.mubr.msk.f32.mxu0 %vm3675_vm1, %v3674_v1 }
 0x29a   :  { %v606_v33 = vpop.f32.mrf.mxu1 }
 0x29c   :  { %v3246_v34 = vpop.f32.mrf.mxu1 }
 0x29e   :  { %v611_v35 = vpop.f32.mrf.mxu1 }
 0x2a0   :  { %v3249_v36 = vpop.f32.mrf.mxu1 }
 0x2a2   :  { %v616_v37 = vpop.f32.mrf.mxu1 }
 0x2a4   :  { %v3252_v38 = vpop.f32.mrf.mxu1 }
 0x2b4   :  { %v517_v39 = vpop.f32.mrf.mxu0 }
 0x2b5   :  { %v607_v40 = vadd.f32 %v606_v33, %v517_v39 }
 0x2b6   :  { %v3235_v41 = vpop.f32.mrf.mxu0 }
 0x2b8   :  { %v522_v42 = vpop.f32.mrf.mxu0 }
 0x2b9   :  { %v612_v43 = vadd.f32 %v611_v35, %v522_v42  ;;  %v2809_v42 = vld [vmem:[%s4524_s3 + $0x78] sm:$0xff] }
 0x2ba   :  { %v3238_v44 = vpop.f32.mrf.mxu0 }
 0x2bb   :  { %v2811_v44 = vld [vmem:[%s4524_s3 + $0x88] sm:$0x3] }
 0x2bc   :  { %v527_v45 = vpop.f32.mrf.mxu0 }
 0x2bd   :  { %v617_v46 = vadd.f32 %v616_v37, %v527_v45  ;;  %v2816_v45 = vld [vmem:[%s4525_s4 + $0x28] sm:$0xff] }
 0x2be   :  { %v3241_v47 = vpop.f32.mrf.mxu0 }
 0x2ce   :  { %v699_v48 = vpop.f32.mrf.mxu0 }
 0x2cf   :  { %3291 = vmatmul.mubr.msk.f32.vlgmr.msra.gmra.mxu1 %vm441_vm5, %v699_v48 }
 0x2d0   :  { %3300 = vmatpush3.msk.msra.mxu1 %vm261_vm3, %v3845_v50  ;;  %v3281_v49 = vpop.f32.mrf.mxu0  ;;  %3293 = vmatprep.mubr.msk.f32.mxu1 %vm3675_vm1, %v3674_v1 }
 0x2d1   :  { %3301 = vmatprep.subr.mxu1 %v3674_v1 }
 0x2d2   :  { %3302 = vmatpush3.msra.mxu1 %v3847_v52  ;;  %v704_v51 = vpop.f32.mrf.mxu0 }
 0x2d3   :  { %3303 = vmatprep.subr.mxu1 %v3674_v1  ;;  %3294 = vmatmul.mubr.msk.f32.gmra.mxu1 %vm441_vm5, %v704_v51 }
 0x2d4   :  { %3304 = vmatpush3.msra.mxu1 %v3852_v54  ;;  %v3284_v53 = vpop.f32.mrf.mxu0  ;;  %3296 = vmatprep.mubr.msk.f32.mxu1 %vm3675_vm1, %v3674_v1 }
 0x2d5   :  { %3305 = vmatprep.subr.mxu1 %v3674_v1 }
 0x2d6   :  { %3306 = vmatpush3.msra.mxu1 %v3856_v56  ;;  %v709_v55 = vpop.f32.mrf.mxu0 }
 0x2d7   :  { %3307 = vmatprep.subr.mxu1 %v3674_v1  ;;  %3297 = vmatmul.mubr.msk.f32.gmra.mxu1 %vm441_vm5, %v709_v55 }
 0x2d8   :  { %3308 = vmatpush3.msra.mxu1 %v3860_v58  ;;  %v3287_v57 = vpop.f32.mrf.mxu0  ;;  %3325 = vmatprep.mubr.msk.f32.mxu1 %vm3675_vm1, %v3674_v1 }
 0x2d9   :  { %3309 = vmatprep.subr.mxu1 %v3674_v1 }
 0x2da   :  { %3310 = vmatpush3.msra.mxu1 %v3864_v60 }
 0x2db   :  { %3311 = vmatprep.subr.mxu1 %v3674_v1 }
 0x2dc   :  { %3312 = vmatpush3.msra.mxu1 %v3868_v62 }
 0x2dd   :  { %3313 = vmatprep.subr.mxu1 %v3674_v1 }
 0x2de   :  { %3314 = vmatpush3.msra.mxu1 %v3872_v0 }
 0x2df   :  { %3315 = vmatprep.subr.mxu1 %v3674_v1 }
 0x2e0   :  { %3316 = vmatpush3.msra.mxu1 %v3876_v3 }
 0x2e1   :  { %3317 = vmatprep.subr.mxu1 %v3674_v1 }
 0x2e2   :  { %3318 = vmatpush3.msra.mxu1 %v3880_v5 }
 0x2e3   :  { %3319 = vmatprep.subr.mxu1 %v3674_v1 }
 0x2e4   :  { %3320 = vmatpush3.msra.mxu1 %v3885_v7 }
 0x2e5   :  { %3321 = vmatprep.subr.mxu1 %v3674_v1 }
 0x2e6   :  { %3322 = vmatpush3.msra.mxu1 %v3889_v8 }
 0x2e7   :  { %3323 = vmatprep.subr.mxu1 %v3674_v1 }
 0x2e8   :  { %3324 = vmatpush3.msra.mxu1 %v3893_v9 }
 0x2e9   :  { %3326 = vmatmul.mubr.msk.f32.vlgmr.msra.gmra.mxu1 %vm251_vm4, %v2787_v59  ;;  %3380 = vmatprep.subr.mxu1 %v3674_v1 }
 0x2ea   :  { %3328 = vmatprep.mubr.msk.f32.mxu1 %vm3675_vm1, %v3674_v1  ;;  %3381 = vmatpush3.msra.mxu1 %v2805_v26 }
 0x2eb   :  { %3391 = vmatprep.subr.mxu1 %v3674_v1 }
 0x2ed   :  { %3329 = vmatmul.mubr.msk.f32.gmra.mxu1 %vm251_vm4, %v2788_v61 }
 0x2ee   :  { %3331 = vmatprep.mubr.msk.f32.mxu1 %vm3675_vm1, %v3674_v1 }
 0x2f1   :  { %3332 = vmatmul.mubr.msk.f32.gmra.mxu1 %vm251_vm4, %v2789_v63 }
 0x2f2   :  { %3382 = vmatprep.mubr.msk.f32.mxu1 %vm3675_vm1, %v3674_v1 }
 0x38f   :  { %v790_v4 = vpop.f32.mrf.mxu1 }
 0x390   :  { %v804_v6 = vadd.f32 %v790_v4, %v607_v40 }
 0x391   :  { %v3292_v10 = vpop.f32.mrf.mxu1 }
 0x393   :  { %v795_v11 = vpop.f32.mrf.mxu1 }
 0x394   :  { %v805_v12 = vadd.f32 %v795_v11, %v612_v43  ;;  %v2810_v43 = vld [vmem:[%s4524_s3 + $0x80] sm:$0xff]  ;;  %v2820_v11 = vld [vmem:[%s4524_s3 + $0x90] sm:$0xff] }
 0x395   :  { %v3295_v13 = vpop.f32.mrf.mxu1 }
 0x396   :  { %v2822_v13 = vld [vmem:[%s4524_s3 + $0xa0] sm:$0x3] }
 0x397   :  { %v800_v14 = vpop.f32.mrf.mxu1 }
 0x398   :  { %v806_v15 = vadd.f32 %v800_v14, %v617_v46  ;;  %v2827_v14 = vld [vmem:[%s4525_s4 + $0x30] sm:$0xff] }
 0x399   :  { %v3298_v16 = vpop.f32.mrf.mxu1 }
 0x3a9   :  { %v886_v17 = vpop.f32.mrf.mxu1 }
 0x3aa   :  { %3337 = vmatmul.mubr.msk.f32.vlgmr.msra.gmra.mxu0 %vm441_vm5, %v886_v17 }
 0x3ab   :  { %3346 = vmatpush3.msk.msra.mxu0 %vm261_vm3, %v3845_v50  ;;  %v3327_v18 = vpop.f32.mrf.mxu1  ;;  %3339 = vmatprep.mubr.msk.f32.mxu0 %vm3675_vm1, %v3674_v1 }
 0x3ac   :  { %3347 = vmatprep.subr.mxu0 %v3674_v1 }
 0x3ad   :  { %3348 = vmatpush3.msra.mxu0 %v3847_v52  ;;  %v891_v19 = vpop.f32.mrf.mxu1 }
 0x3ae   :  { %3349 = vmatprep.subr.mxu0 %v3674_v1  ;;  %3340 = vmatmul.mubr.msk.f32.gmra.mxu0 %vm441_vm5, %v891_v19 }
 0x3af   :  { %3350 = vmatpush3.msra.mxu0 %v3852_v54  ;;  %v3330_v20 = vpop.f32.mrf.mxu1  ;;  %3342 = vmatprep.mubr.msk.f32.mxu0 %vm3675_vm1, %v3674_v1 }
 0x3b0   :  { %3351 = vmatprep.subr.mxu0 %v3674_v1 }
 0x3b1   :  { %3352 = vmatpush3.msra.mxu0 %v3856_v56  ;;  %v896_v21 = vpop.f32.mrf.mxu1 }
 0x3b2   :  { %3353 = vmatprep.subr.mxu0 %v3674_v1  ;;  %3343 = vmatmul.mubr.msk.f32.gmra.mxu0 %vm441_vm5, %v896_v21 }
 0x3b3   :  { %3354 = vmatpush3.msra.mxu0 %v3860_v58  ;;  %v3333_v22 = vpop.f32.mrf.mxu1  ;;  %3371 = vmatprep.mubr.msk.f32.mxu0 %vm3675_vm1, %v3674_v1 }
 0x3b4   :  { %3355 = vmatprep.subr.mxu0 %v3674_v1 }
 0x3b5   :  { %3356 = vmatpush3.msra.mxu0 %v3864_v60 }
 0x3b6   :  { %3357 = vmatprep.subr.mxu0 %v3674_v1 }
 0x3b7   :  { %3358 = vmatpush3.msra.mxu0 %v3868_v62 }
 0x3b8   :  { %3359 = vmatprep.subr.mxu0 %v3674_v1 }
 0x3b9   :  { %3360 = vmatpush3.msra.mxu0 %v3872_v0 }
 0x3ba   :  { %3361 = vmatprep.subr.mxu0 %v3674_v1 }
 0x3bb   :  { %3362 = vmatpush3.msra.mxu0 %v3876_v3 }
 0x3bc   :  { %3363 = vmatprep.subr.mxu0 %v3674_v1 }
 0x3bd   :  { %3364 = vmatpush3.msra.mxu0 %v3880_v5 }
 0x3be   :  { %3365 = vmatprep.subr.mxu0 %v3674_v1 }
 0x3bf   :  { %3366 = vmatpush3.msra.mxu0 %v3885_v7 }
 0x3c0   :  { %3367 = vmatprep.subr.mxu0 %v3674_v1 }
 0x3c1   :  { %3368 = vmatpush3.msra.mxu0 %v3889_v8 }
 0x3c2   :  { %3369 = vmatprep.subr.mxu0 %v3674_v1 }
 0x3c3   :  { %3370 = vmatpush3.msra.mxu0 %v3893_v9 }
 0x3c4   :  { %3372 = vmatmul.mubr.msk.f32.vlgmr.msra.gmra.mxu0 %vm251_vm4, %v2798_v23  ;;  %3426 = vmatprep.subr.mxu0 %v3674_v1 }
 0x3c5   :  { %3374 = vmatprep.mubr.msk.f32.mxu0 %vm3675_vm1, %v3674_v1  ;;  %3427 = vmatpush3.msra.mxu0 %v2816_v45 }
 0x3c6   :  { %3437 = vmatprep.subr.mxu0 %v3674_v1 }
 0x3c8   :  { %3375 = vmatmul.mubr.msk.f32.gmra.mxu0 %vm251_vm4, %v2799_v24 }
 0x3c9   :  { %3377 = vmatprep.mubr.msk.f32.mxu0 %vm3675_vm1, %v3674_v1 }
 0x3cc   :  { %3378 = vmatmul.mubr.msk.f32.gmra.mxu0 %vm251_vm4, %v2800_v25 }
 0x3cd   :  { %3428 = vmatprep.mubr.msk.f32.mxu0 %vm3675_vm1, %v3674_v1 }
 0x46a   :  { %v977_v27 = vpop.f32.mrf.mxu0 }
 0x46b   :  { %v991_v28 = vadd.f32 %v977_v27, %v804_v6 }
 0x46c   :  { %v3338_v29 = vpop.f32.mrf.mxu0 }
 0x46e   :  { %v982_v30 = vpop.f32.mrf.mxu0 }
 0x46f   :  { %v992_v31 = vadd.f32 %v982_v30, %v805_v12  ;;  %v2821_v12 = vld [vmem:[%s4524_s3 + $0x98] sm:$0xff]  ;;  %v2831_v30 = vld [vmem:[%s4524_s3 + $0xa8] sm:$0xff] }
 0x470   :  { %v3341_v32 = vpop.f32.mrf.mxu0 }
 0x471   :  { %v2833_v32 = vld [vmem:[%s4524_s3 + $0xb8] sm:$0x3] }
 0x472   :  { %v987_v33 = vpop.f32.mrf.mxu0 }
 0x473   :  { %v993_v34 = vadd.f32 %v987_v33, %v806_v15  ;;  %v2838_v33 = vld [vmem:[%s4525_s4 + $0x38] sm:$0xff] }
 0x474   :  { %v3344_v35 = vpop.f32.mrf.mxu0 }
 0x484   :  { %v1073_v36 = vpop.f32.mrf.mxu0 }
 0x485   :  { %3383 = vmatmul.mubr.msk.f32.vlgmr.msra.gmra.mxu1 %vm441_vm5, %v1073_v36 }
 0x486   :  { %3392 = vmatpush3.msk.msra.mxu1 %vm261_vm3, %v3845_v50  ;;  %v3373_v37 = vpop.f32.mrf.mxu0  ;;  %3385 = vmatprep.mubr.msk.f32.mxu1 %vm3675_vm1, %v3674_v1 }
 0x487   :  { %3393 = vmatprep.subr.mxu1 %v3674_v1 }
 0x488   :  { %3394 = vmatpush3.msra.mxu1 %v3847_v52  ;;  %v1078_v38 = vpop.f32.mrf.mxu0 }
 0x489   :  { %3395 = vmatprep.subr.mxu1 %v3674_v1  ;;  %3386 = vmatmul.mubr.msk.f32.gmra.mxu1 %vm441_vm5, %v1078_v38 }
 0x48a   :  { %3396 = vmatpush3.msra.mxu1 %v3852_v54  ;;  %v3376_v39 = vpop.f32.mrf.mxu0  ;;  %3388 = vmatprep.mubr.msk.f32.mxu1 %vm3675_vm1, %v3674_v1 }
 0x48b   :  { %3397 = vmatprep.subr.mxu1 %v3674_v1 }
 0x48c   :  { %3398 = vmatpush3.msra.mxu1 %v3856_v56  ;;  %v1083_v40 = vpop.f32.mrf.mxu0 }
 0x48d   :  { %3399 = vmatprep.subr.mxu1 %v3674_v1  ;;  %3389 = vmatmul.mubr.msk.f32.gmra.mxu1 %vm441_vm5, %v1083_v40 }
 0x48e   :  { %3400 = vmatpush3.msra.mxu1 %v3860_v58  ;;  %v3379_v41 = vpop.f32.mrf.mxu0  ;;  %3417 = vmatprep.mubr.msk.f32.mxu1 %vm3675_vm1, %v3674_v1 }
 0x48f   :  { %3401 = vmatprep.subr.mxu1 %v3674_v1 }
 0x490   :  { %3402 = vmatpush3.msra.mxu1 %v3864_v60 }
 0x491   :  { %3403 = vmatprep.subr.mxu1 %v3674_v1 }
 0x492   :  { %3404 = vmatpush3.msra.mxu1 %v3868_v62 }
 0x493   :  { %3405 = vmatprep.subr.mxu1 %v3674_v1 }
 0x494   :  { %3406 = vmatpush3.msra.mxu1 %v3872_v0 }
 0x495   :  { %3407 = vmatprep.subr.mxu1 %v3674_v1 }
 0x496   :  { %3408 = vmatpush3.msra.mxu1 %v3876_v3 }
 0x497   :  { %3409 = vmatprep.subr.mxu1 %v3674_v1 }
 0x498   :  { %3410 = vmatpush3.msra.mxu1 %v3880_v5 }
 0x499   :  { %3411 = vmatprep.subr.mxu1 %v3674_v1 }
 0x49a   :  { %3412 = vmatpush3.msra.mxu1 %v3885_v7 }
 0x49b   :  { %3413 = vmatprep.subr.mxu1 %v3674_v1 }
 0x49c   :  { %3414 = vmatpush3.msra.mxu1 %v3889_v8 }
 0x49d   :  { %3415 = vmatprep.subr.mxu1 %v3674_v1 }
 0x49e   :  { %3416 = vmatpush3.msra.mxu1 %v3893_v9 }
 0x49f   :  { %3418 = vmatmul.mubr.msk.f32.vlgmr.msra.gmra.mxu1 %vm251_vm4, %v2809_v42  ;;  %3472 = vmatprep.subr.mxu1 %v3674_v1 }
 0x4a0   :  { %3420 = vmatprep.mubr.msk.f32.mxu1 %vm3675_vm1, %v3674_v1  ;;  %3473 = vmatpush3.msra.mxu1 %v2827_v14 }
 0x4a1   :  { %3483 = vmatprep.subr.mxu1 %v3674_v1 }
 0x4a3   :  { %3421 = vmatmul.mubr.msk.f32.gmra.mxu1 %vm251_vm4, %v2810_v43 }
 0x4a4   :  { %3423 = vmatprep.mubr.msk.f32.mxu1 %vm3675_vm1, %v3674_v1 }
 0x4a7   :  { %3424 = vmatmul.mubr.msk.f32.gmra.mxu1 %vm251_vm4, %v2811_v44 }
 0x4a8   :  { %3474 = vmatprep.mubr.msk.f32.mxu1 %vm3675_vm1, %v3674_v1 }
 0x545   :  { %v1164_v46 = vpop.f32.mrf.mxu1 }
 0x546   :  { %v1178_v47 = vadd.f32 %v1164_v46, %v991_v28 }
 0x547   :  { %v3384_v48 = vpop.f32.mrf.mxu1 }
 0x549   :  { %v1169_v49 = vpop.f32.mrf.mxu1 }
 0x54a   :  { %v1179_v51 = vadd.f32 %v1169_v49, %v992_v31  ;;  %v2832_v31 = vld [vmem:[%s4524_s3 + $0xb0] sm:$0xff]  ;;  %v2855_v49 = vld [vmem:[%s4527_s6 + $0x18] sm:$0xff] }
 0x54b   :  { %v3387_v53 = vpop.f32.mrf.mxu1 }
 0x54d   :  { %v1174_v55 = vpop.f32.mrf.mxu1 }
 0x54e   :  { %v1180_v57 = vadd.f32 %v1174_v55, %v993_v34 }
 0x54f   :  { %v3390_v59 = vpop.f32.mrf.mxu1 }
 0x55f   :  { %v1260_v61 = vpop.f32.mrf.mxu1 }
 0x560   :  { %3429 = vmatmul.mubr.msk.f32.vlgmr.msra.gmra.mxu0 %vm441_vm5, %v1260_v61 }
 0x561   :  { %3438 = vmatpush3.msk.msra.mxu0 %vm261_vm3, %v3845_v50  ;;  %v3419_v63 = vpop.f32.mrf.mxu1  ;;  %3431 = vmatprep.mubr.msk.f32.mxu0 %vm3675_vm1, %v3674_v1 }
 0x562   :  { %3439 = vmatprep.subr.mxu0 %v3674_v1  ;;  %v2854_v63 = vld [vmem:[%s4527_s6 + $0x10] sm:$0xff] }
 0x563   :  { %3440 = vmatpush3.msra.mxu0 %v3847_v52  ;;  %v1265_v2 = vpop.f32.mrf.mxu1 }
 0x564   :  { %3441 = vmatprep.subr.mxu0 %v3674_v1  ;;  %3432 = vmatmul.mubr.msk.f32.gmra.mxu0 %vm441_vm5, %v1265_v2  ;;  %v2868_v2 = vld [vmem:[%s4527_s6 + $0x58] sm:$0xff] }
 0x565   :  { %3442 = vmatpush3.msra.mxu0 %v3852_v54  ;;  %v3422_v4 = vpop.f32.mrf.mxu1  ;;  %3434 = vmatprep.mubr.msk.f32.mxu0 %vm3675_vm1, %v3674_v1 }
 0x566   :  { %3443 = vmatprep.subr.mxu0 %v3674_v1  ;;  %v2867_v4 = vld [vmem:[%s4527_s6 + $0x50] sm:$0xff] }
 0x567   :  { %3444 = vmatpush3.msra.mxu0 %v3856_v56  ;;  %v1270_v6 = vpop.f32.mrf.mxu1 }
 0x568   :  { %3445 = vmatprep.subr.mxu0 %v3674_v1  ;;  %3435 = vmatmul.mubr.msk.f32.gmra.mxu0 %vm441_vm5, %v1270_v6 }
 0x569   :  { %3446 = vmatpush3.msra.mxu0 %v3860_v58  ;;  %v3425_v10 = vpop.f32.mrf.mxu1  ;;  %3463 = vmatprep.mubr.msk.f32.mxu0 %vm3675_vm1, %v3674_v1 }
 0x56a   :  { %3447 = vmatprep.subr.mxu0 %v3674_v1  ;;  %v4411_v10 = vld [vmem:[%s4526_s5] ss:$0 sm:$0xff] }
 0x56b   :  { %3448 = vmatpush3.msra.mxu0 %v3864_v60 }
 0x56c   :  { %3449 = vmatprep.subr.mxu0 %v3674_v1 }
 0x56d   :  { %3450 = vmatpush3.msra.mxu0 %v3868_v62 }
 0x56e   :  { %3451 = vmatprep.subr.mxu0 %v3674_v1 }
 0x56f   :  { %3452 = vmatpush3.msra.mxu0 %v3872_v0 }
 0x570   :  { %3453 = vmatprep.subr.mxu0 %v3674_v1 }
 0x571   :  { %3454 = vmatpush3.msra.mxu0 %v3876_v3 }
 0x572   :  { %3455 = vmatprep.subr.mxu0 %v3674_v1 }
 0x573   :  { %3456 = vmatpush3.msra.mxu0 %v3880_v5 }
 0x574   :  { %3457 = vmatprep.subr.mxu0 %v3674_v1 }
 0x575   :  { %3458 = vmatpush3.msra.mxu0 %v3885_v7 }
 0x576   :  { %3459 = vmatprep.subr.mxu0 %v3674_v1 }
 0x577   :  { %3460 = vmatpush3.msra.mxu0 %v3889_v8 }
 0x578   :  { %3461 = vmatprep.subr.mxu0 %v3674_v1 }
 0x579   :  { %3462 = vmatpush3.msra.mxu0 %v3893_v9 }
 0x57a   :  { %3464 = vmatmul.mubr.msk.f32.vlgmr.msra.gmra.mxu0 %vm251_vm4, %v2820_v11  ;;  %3518 = vmatprep.subr.mxu0 %v3674_v1 }
 0x57b   :  { %3466 = vmatprep.mubr.msk.f32.mxu0 %vm3675_vm1, %v3674_v1  ;;  %3519 = vmatpush3.msra.mxu0 %v2838_v33  ;;  %v2861_v33 = vld [vmem:[%s4527_s6 + $0x30] sm:$0xff] }
 0x57c   :  { %3529 = vmatprep.subr.mxu0 %v3674_v1 }
 0x57e   :  { %3467 = vmatmul.mubr.msk.f32.gmra.mxu0 %vm251_vm4, %v2821_v12 }
 0x57f   :  { %3469 = vmatprep.mubr.msk.f32.mxu0 %vm3675_vm1, %v3674_v1 }
 0x582   :  { %3470 = vmatmul.mubr.msk.f32.gmra.mxu0 %vm251_vm4, %v2822_v13 }
 0x583   :  { %3520 = vmatprep.mubr.msk.f32.mxu0 %vm3675_vm1, %v3674_v1 }
 0x620   :  { %v1351_v15 = vpop.f32.mrf.mxu0 }
 0x621   :  { %v1365_v16 = vadd.f32 %v1351_v15, %v1178_v47 }
 0x622   :  { %v3430_v17 = vpop.f32.mrf.mxu0 }
 0x624   :  { %v1356_v18 = vpop.f32.mrf.mxu0 }
 0x625   :  { %v1366_v19 = vadd.f32 %v1356_v18, %v1179_v51 }
 0x626   :  { %v3433_v20 = vpop.f32.mrf.mxu0 }
 0x627   :  { %v1943_v20 = vld [vmem:[%s4527_s6 + $0x8] sm:$0xff] }
 0x628   :  { %v1361_v21 = vpop.f32.mrf.mxu0 }
 0x629   :  { %v1367_v22 = vadd.f32 %v1361_v21, %v1180_v57 }
 0x62a   :  { %v3436_v23 = vpop.f32.mrf.mxu0 }
 0x62b   :  { %v1942_v23 = vld [vmem:[%s4527_s6] sm:$0xff] }
 0x63a   :  { %v1447_v24 = vpop.f32.mrf.mxu0 }
 0x63b   :  { %3475 = vmatmul.mubr.msk.f32.vlgmr.msra.gmra.mxu1 %vm441_vm5, %v1447_v24 }
 0x63c   :  { %3484 = vmatpush3.msk.msra.mxu1 %vm261_vm3, %v3845_v50  ;;  %v3465_v25 = vpop.f32.mrf.mxu0  ;;  %3477 = vmatprep.mubr.msk.f32.mxu1 %vm3675_vm1, %v3674_v1 }
 0x63d   :  { %3485 = vmatprep.subr.mxu1 %v3674_v1 }
 0x63e   :  { %3486 = vmatpush3.msra.mxu1 %v3847_v52  ;;  %v1452_v26 = vpop.f32.mrf.mxu0 }
 0x63f   :  { %3487 = vmatprep.subr.mxu1 %v3674_v1  ;;  %3478 = vmatmul.mubr.msk.f32.gmra.mxu1 %vm441_vm5, %v1452_v26  ;;  %v2859_v26 = vld [vmem:[%s4527_s6 + $0x28] sm:$0xff] }
 0x640   :  { %3488 = vmatpush3.msra.mxu1 %v3852_v54  ;;  %v3468_v27 = vpop.f32.mrf.mxu0  ;;  %3480 = vmatprep.mubr.msk.f32.mxu1 %vm3675_vm1, %v3674_v1 }
 0x641   :  { %3489 = vmatprep.subr.mxu1 %v3674_v1  ;;  %v2874_v27 = vld [vmem:[%s4527_s6 + $0x78] sm:$0xff] }
 0x642   :  { %3490 = vmatpush3.msra.mxu1 %v3856_v56  ;;  %v1457_v28 = vpop.f32.mrf.mxu0 }
 0x643   :  { %3491 = vmatprep.subr.mxu1 %v3674_v1  ;;  %3481 = vmatmul.mubr.msk.f32.gmra.mxu1 %vm441_vm5, %v1457_v28  ;;  %v2858_v28 = vld [vmem:[%s4527_s6 + $0x20] sm:$0xff] }
 0x644   :  { %3492 = vmatpush3.msra.mxu1 %v3860_v58  ;;  %v3471_v29 = vpop.f32.mrf.mxu0  ;;  %3509 = vmatprep.mubr.msk.f32.mxu1 %vm3675_vm1, %v3674_v1 }
 0x645   :  { %3493 = vmatprep.subr.mxu1 %v3674_v1  ;;  %v2873_v29 = vld [vmem:[%s4527_s6 + $0x70] sm:$0xff] }
 0x646   :  { %3494 = vmatpush3.msra.mxu1 %v3864_v60 }
 0x647   :  { %3495 = vmatprep.subr.mxu1 %v3674_v1 }
 0x648   :  { %3496 = vmatpush3.msra.mxu1 %v3868_v62 }
 0x649   :  { %3497 = vmatprep.subr.mxu1 %v3674_v1 }
 0x64a   :  { %3498 = vmatpush3.msra.mxu1 %v3872_v0 }
 0x64b   :  { %3499 = vmatprep.subr.mxu1 %v3674_v1 }
 0x64c   :  { %3500 = vmatpush3.msra.mxu1 %v3876_v3 }
 0x64d   :  { %3501 = vmatprep.subr.mxu1 %v3674_v1 }
 0x64e   :  { %3502 = vmatpush3.msra.mxu1 %v3880_v5 }
 0x64f   :  { %3503 = vmatprep.subr.mxu1 %v3674_v1 }
 0x650   :  { %3504 = vmatpush3.msra.mxu1 %v3885_v7 }
 0x651   :  { %3505 = vmatprep.subr.mxu1 %v3674_v1 }
 0x652   :  { %3506 = vmatpush3.msra.mxu1 %v3889_v8 }
 0x653   :  { %3507 = vmatprep.subr.mxu1 %v3674_v1 }
 0x654   :  { %3508 = vmatpush3.msra.mxu1 %v3893_v9 }
 0x655   :  { %3510 = vmatmul.mubr.msk.f32.vlgmr.msra.gmra.mxu1 %vm251_vm4, %v2831_v30  ;;  %3564 = vmatprep.subr.mxu1 %v3674_v1 }
 0x656   :  { %3512 = vmatprep.mubr.msk.f32.mxu1 %vm3675_vm1, %v3674_v1 }
 0x659   :  { %3513 = vmatmul.mubr.msk.f32.gmra.mxu1 %vm251_vm4, %v2832_v31 }
 0x65a   :  { %3515 = vmatprep.mubr.msk.f32.mxu1 %vm3675_vm1, %v3674_v1 }
 0x65d   :  { %3516 = vmatmul.mubr.msk.f32.gmra.mxu1 %vm251_vm4, %v2833_v32  ;;  %v2862_v32 = vld [vmem:[%s4527_s6 + $0x38] sm:$0xff] }
 0x65e   :  { %3566 = vmatprep.mubr.msk.f32.mxu1 %vm3675_vm1, %v3674_v1 }
 0x6fb   :  { %v1538_v34 = vpop.f32.mrf.mxu1 }
 0x6fc   :  { %v1552_v35 = vadd.f32 %v1538_v34, %v1365_v16 }
 0x6fd   :  { %v3476_v36 = vpop.f32.mrf.mxu1 }
 0x6fe   :  { %v2864_v36 = vld [vmem:[%s4527_s6 + $0x40] sm:$0xff] }
 0x6ff   :  { %v1543_v37 = vpop.f32.mrf.mxu1 }
 0x700   :  { %v1553_v38 = vadd.f32 %v1543_v37, %v1366_v19 }
 0x701   :  { %v3479_v39 = vpop.f32.mrf.mxu1 }
 0x702   :  { %v2870_v39 = vld [vmem:[%s4527_s6 + $0x60] sm:$0xff] }
 0x703   :  { %v1548_v40 = vpop.f32.mrf.mxu1 }
 0x704   :  { %v1554_v41 = vadd.f32 %v1548_v40, %v1367_v22 }
 0x705   :  { %v3482_v42 = vpop.f32.mrf.mxu1 }
 0x706   :  { %v2877_v42 = vld [vmem:[%s4527_s6 + $0x88] sm:$0xff] }
 0x715   :  { %v1634_v43 = vpop.f32.mrf.mxu1 }
 0x716   :  { %3521 = vmatmul.mubr.msk.f32.vlgmr.msra.gmra.mxu0 %vm441_vm5, %v1634_v43  ;;  %v2876_v43 = vld [vmem:[%s4527_s6 + $0x80] sm:$0xff] }
 0x717   :  { %3530 = vmatpush3.msk.msra.mxu0 %vm261_vm3, %v3845_v50  ;;  %v3511_v44 = vpop.f32.mrf.mxu1  ;;  %3523 = vmatprep.mubr.msk.f32.mxu0 %vm3675_vm1, %v3674_v1 }
 0x718   :  { %3531 = vmatprep.subr.mxu0 %v3674_v1 }
 0x719   :  { %3532 = vmatpush3.msra.mxu0 %v3847_v52  ;;  %v1639_v45 = vpop.f32.mrf.mxu1 }
 0x71a   :  { %3533 = vmatprep.subr.mxu0 %v3674_v1  ;;  %3524 = vmatmul.mubr.msk.f32.gmra.mxu0 %vm441_vm5, %v1639_v45  ;;  %v2645_v45 = vld [vmem:[%s4529_s8 + $0x18] sm:$0xff] }
 0x71b   :  { %3534 = vmatpush3.msra.mxu0 %v3852_v54  ;;  %v3514_v46 = vpop.f32.mrf.mxu1  ;;  %3526 = vmatprep.mubr.msk.f32.mxu0 %vm3675_vm1, %v3674_v1  ;;  %v2842_v54 = vld [vmem:[%s4524_s3 + $0xc0] sm:$0xff] }
 0x71c   :  { %3535 = vmatprep.subr.mxu0 %v3674_v1  ;;  %v2644_v46 = vld [vmem:[%s4529_s8 + $0x10] sm:$0xff] }
 0x71d   :  { %3536 = vmatpush3.msra.mxu0 %v3856_v56  ;;  %v1644_v50 = vpop.f32.mrf.mxu1  ;;  %v2843_v56 = vld [vmem:[%s4524_s3 + $0xc8] sm:$0xff] }
 0x71e   :  { %3537 = vmatprep.subr.mxu0 %v3674_v1  ;;  %3527 = vmatmul.mubr.msk.f32.gmra.mxu0 %vm441_vm5, %v1644_v50  ;;  %v2643_v50 = vld [vmem:[%s4529_s8 + $0x8] sm:$0xff] }
 0x71f   :  { %3538 = vmatpush3.msra.mxu0 %v3860_v58  ;;  %v3517_v52 = vpop.f32.mrf.mxu1  ;;  %3555 = vmatprep.mubr.msk.f32.mxu0 %vm3675_vm1, %v3674_v1  ;;  %v2844_v58 = vld [vmem:[%s4524_s3 + $0xd0] sm:$0x3] }
 0x720   :  { %3539 = vmatprep.subr.mxu0 %v3674_v1  ;;  %v2642_v52 = vld [vmem:[%s4529_s8] sm:$0xff] }
 0x721   :  { %3540 = vmatpush3.msra.mxu0 %v3864_v60  ;;  %v2849_v60 = vld [vmem:[%s4525_s4 + $0x40] sm:$0xff] }
 0x722   :  { %3541 = vmatprep.subr.mxu0 %v3674_v1  ;;  %3565 = vmatpush3.msra.mxu1 %v2849_v60 }
 0x723   :  { %3542 = vmatpush3.msra.mxu0 %v3868_v62  ;;  %3575 = vmatprep.subr.mxu1 %v3674_v1 }
 0x724   :  { %3543 = vmatprep.subr.mxu0 %v3674_v1 }
 0x725   :  { %3544 = vmatpush3.msra.mxu0 %v3872_v0 }
 0x726   :  { %3545 = vmatprep.subr.mxu0 %v3674_v1 }
 0x727   :  { %3546 = vmatpush3.msra.mxu0 %v3876_v3 }
 0x728   :  { %3547 = vmatprep.subr.mxu0 %v3674_v1 }
 0x729   :  { %3548 = vmatpush3.msra.mxu0 %v3880_v5 }
 0x72a   :  { %3549 = vmatprep.subr.mxu0 %v3674_v1 }
 0x72b   :  { %3550 = vmatpush3.msra.mxu0 %v3885_v7 }
 0x72c   :  { %3551 = vmatprep.subr.mxu0 %v3674_v1 }
 0x72d   :  { %3552 = vmatpush3.msra.mxu0 %v3889_v8 }
 0x72e   :  { %3553 = vmatprep.subr.mxu0 %v3674_v1 }
 0x72f   :  { %3554 = vmatpush3.msra.mxu0 %v3893_v9 }
 0x730   :  { %3556 = vmatmul.mubr.msk.f32.vlgmr.msra.gmra.mxu0 %vm251_vm4, %v2842_v54  ;;  %3610 = vmatprep.subr.mxu0 %v3674_v1 }
 0x731   :  { %3558 = vmatprep.mubr.msk.f32.mxu0 %vm3675_vm1, %v3674_v1  ;;  %3611 = vmatpush3.msra.mxu0 %v2868_v2 }
 0x732   :  { %3612 = vmatprep.subr.mxu0 %v3674_v1 }
 0x733   :  { %3613 = vmatpush3.msra.mxu0 %v2867_v4 }
 0x734   :  { %3559 = vmatmul.mubr.msk.f32.gmra.mxu0 %vm251_vm4, %v2843_v56  ;;  %3624 = vmatprep.subr.mxu0 %v3674_v1 }
 0x735   :  { %3561 = vmatprep.mubr.msk.f32.mxu0 %vm3675_vm1, %v3674_v1 }
 0x738   :  { %3562 = vmatmul.mubr.msk.f32.gmra.mxu0 %vm251_vm4, %v2844_v58 }
 0x739   :  { %3614 = vmatprep.mubr.msk.f32.mxu0 %vm3675_vm1, %v3674_v1 }
 0x7d6   :  { %v1725_v62 = vpop.f32.mrf.mxu0 }
 0x7d7   :  { %v1739_v0 = vadd.f32 %v1725_v62, %v1552_v35  ;;  %v2865_v35 = vld [vmem:[%s4527_s6 + $0x48] sm:$0xff] }
 0x7d8   :  { %v3522_v3 = vpop.f32.mrf.mxu0 }
 0x7da   :  { %v1730_v5 = vpop.f32.mrf.mxu0 }
 0x7db   :  { %v1740_v7 = vadd.f32 %v1730_v5, %v1553_v38  ;;  %v2871_v38 = vld [vmem:[%s4527_s6 + $0x68] sm:$0xff] }
 0x7dc   :  { %v3525_v8 = vpop.f32.mrf.mxu0 }
 0x7de   :  { %v1735_v9 = vpop.f32.mrf.mxu0 }
 0x7df   :  { %v4381_v47 = vadd.f32 %v1735_v9, %v1554_v41 }
 0x7e0   :  { %v3528_v48 = vpop.f32.mrf.mxu0 }
 0x7f0   :  { %v1821_v51 = vpop.f32.mrf.mxu0 }
 0x7f1   :  { %3567 = vmatmul.mubr.msk.f32.vlgmr.msra.gmra.mxu1 %vm441_vm5, %v1821_v51 }
 0x7f2   :  { %v3557_v53 = vpop.f32.mrf.mxu0  ;;  %3569 = vmatprep.mubr.msk.f32.mxu1 %vm3675_vm1, %v3674_v1  ;;  %3576 = vmatpush3.msra.mxu1 %v2855_v49 }
 0x7f3   :  { %3577 = vmatprep.subr.mxu1 %v3674_v1 }
 0x7f4   :  { %v1826_v55 = vpop.f32.mrf.mxu0  ;;  %3578 = vmatpush3.msra.mxu1 %v2854_v63 }
 0x7f5   :  { %3570 = vmatmul.mubr.msk.f32.gmra.mxu1 %vm441_vm5, %v1826_v55  ;;  %3582 = vmatprep.subr.mxu1 %v3674_v1 }
 0x7f6   :  { %v3560_v57 = vpop.f32.mrf.mxu0  ;;  %3572 = vmatprep.mubr.msk.f32.mxu1 %vm3675_vm1, %v3674_v1 }
 0x7f8   :  { %v1831_v59 = vpop.f32.mrf.mxu0 }
 0x7f9   :  { %3573 = vmatmul.mubr.msk.f32.gmra.mxu1 %vm441_vm5, %v1831_v59 }
 0x7fa   :  { %v3563_v61 = vpop.f32.mrf.mxu0  ;;  %3579 = vmatprep.mubr.msk.f32.mxu1 %vm3675_vm1, %v3674_v1 }
 0x8b1   :  { %v1912_v6 = vpop.f32.mrf.mxu1 }
 0x8b2   :  { %v1926_v11 = vadd.f32 %v1912_v6, %v1739_v0  ;;  %v2879_v6 = vld [vmem:[%s4528_s7] ss:$0 sm:$0xff] }
 0x8b3   :  { %v3568_v12 = vpop.f32.mrf.mxu1 }
 0x8b4   :  { %v1936_v13 = vadd.f32 %v4411_v10, %v1926_v11 }
 0x8b5   :  { %v1917_v14 = vpop.f32.mrf.mxu1 }
 0x8b6   :  { %v1939_v15 = vmax.f32 %v1936_v13, 0.0  ;;  %v1927_v16 = vadd.f32 %v1917_v14, %v1740_v7  ;;  %v2880_v14 = vld [vmem:[%s4530_s9] ss:$0 sm:$0xff] }
 0x8b7   :  { %v3571_v17 = vpop.f32.mrf.mxu1 }
 0x8b8   :  { %v1948_v18 = vrot.slane %v1939_v15, 2  ;;  %v1937_v19 = vadd.f32 %v4411_v10, %v1927_v16  ;;  %v2097_v30 = vrot.slane %v1939_v15, 4  ;;  %v2174_v34 = vrot.slane %v1939_v15, 6 }
 0x8b9   :  { %v1922_v21 = vpop.f32.mrf.mxu1 }
 0x8ba   :  { %v1940_v22 = vmax.f32 %v1937_v19, 0.0  ;;  %3580 = vmatmul.mubr.msk.f32.vlgmr.msra.gmra.mxu1 %vm1949_vm6, %v1948_v18  ;;  %v1928_v37 = vadd.f32 %v1922_v21, %v4381_v47 }
 0x8bb   :  { %3583 = vmatpush3.msra.mxu1 %v1943_v20  ;;  %3586 = vmatprep.mubr.msk.f32.mxu1 %vm3675_vm1, %v3674_v1  ;;  %v3574_v24 = vpop.f32.mrf.mxu1 }
 0x8bc   :  { %v2328_v25 = vrot.slane %v1940_v22, 2  ;;  %3584 = vmatprep.subr.mxu1 %v3674_v1  ;;  %v2482_v31 = vrot.slane %v1940_v22, 6  ;;  %v2405_v40 = vrot.slane %v1940_v22, 4  ;;  %v1938_v41 = vadd.f32 %v4411_v10, %v1928_v37 }
 0x8bd   :  { %3585 = vmatpush3.msra.mxu1 %v1942_v23 }
 0x8be   :  { %3589 = vmatprep.subr.mxu1 %v3674_v1  ;;  %3587 = vmatmul.mubr.msk.f32.vlgmr.msra.gmra.mxu1 %vm1949_vm6, %v1939_v15  ;;  %v1941_v44 = vmax.f32 %v1938_v41, 0.0 }
 0x8bf   :  { %3590 = vmatpush3.msra.mxu1 %v2859_v26  ;;  %3615 = vmatmul.mubr.msk.f32.vlgmr.msra.gmra.mxu0 %vm1949_vm6, %v2328_v25 }
 0x8c0   :  { %3591 = vmatprep.subr.mxu1 %v3674_v1  ;;  %3625 = vmatpush3.msra.mxu0 %v2874_v27 }
 0x8c1   :  { %3592 = vmatpush3.msra.mxu1 %v2858_v28  ;;  %3626 = vmatprep.subr.mxu0 %v3674_v1 }
 0x8c2   :  { %3593 = vmatprep.mubr.msk.f32.mxu1 %vm3675_vm1, %v3674_v1  ;;  %3596 = vmatprep.subr.mxu1 %v3674_v1 }
 0x8c3   :  { %3627 = vmatpush3.msra.mxu0 %v2873_v29  ;;  %3628 = vmatprep.mubr.msk.f32.mxu0 %vm3675_vm1, %v3674_v1 }
 0x8c4   :  { %3594 = vmatmul.mubr.msk.f32.vlgmr.msra.gmra.mxu1 %vm1949_vm6, %v2097_v30  ;;  %3629 = vmatmul.mubr.msk.f32.vlgmr.msra.gmra.mxu0 %vm1949_vm6, %v2482_v31 }
 0x8c5   :  { %3597 = vmatpush3.msra.mxu1 %v2862_v32  ;;  %3600 = vmatprep.mubr.msk.f32.mxu1 %vm3675_vm1, %v3674_v1 }
 0x8c6   :  { %3598 = vmatprep.subr.mxu1 %v3674_v1  ;;  %3638 = vmatprep.subr.mxu0 %v3674_v1 }
 0x8c7   :  { %3599 = vmatpush3.msra.mxu1 %v2861_v33  ;;  %3646 = vmatprep.mubr.msk.f32.mxu0 %vm3675_vm1, %v3674_v1 }
 0x8c8   :  { %3603 = vmatprep.subr.mxu1 %v3674_v1  ;;  %3601 = vmatmul.mubr.msk.f32.vlgmr.msra.gmra.mxu1 %vm1949_vm6, %v2174_v34 }
 0x8c9   :  { %3604 = vmatpush3.msra.mxu1 %v2865_v35  ;;  %3607 = vmatprep.mubr.msk.f32.mxu1 %vm3675_vm1, %v3674_v1 }
 0x8ca   :  { %3605 = vmatprep.subr.mxu1 %v3674_v1  ;;  %3639 = vmatpush3.msra.mxu0 %v2645_v45 }
 0x8cb   :  { %3606 = vmatpush3.msra.mxu1 %v2864_v36  ;;  %3640 = vmatprep.subr.mxu0 %v3674_v1 }
 0x8cc   :  { %3617 = vmatprep.subr.mxu1 %v3674_v1  ;;  %3608 = vmatmul.mubr.msk.f32.vlgmr.msra.gmra.mxu1 %vm1949_vm6, %v1940_v22 }
 0x8cd   :  { %3618 = vmatpush3.msra.mxu1 %v2871_v38  ;;  %3621 = vmatprep.mubr.msk.f32.mxu1 %vm3675_vm1, %v3674_v1 }
 0x8ce   :  { %3619 = vmatprep.subr.mxu1 %v3674_v1  ;;  %3641 = vmatpush3.msra.mxu0 %v2644_v46 }
 0x8cf   :  { %3620 = vmatpush3.msra.mxu1 %v2870_v39  ;;  %3642 = vmatprep.subr.mxu0 %v3674_v1 }
 0x8d0   :  { %3631 = vmatprep.subr.mxu1 %v3674_v1  ;;  %3622 = vmatmul.mubr.msk.f32.vlgmr.msra.gmra.mxu1 %vm1949_vm6, %v2405_v40 }
 0x8d1   :  { %3632 = vmatpush3.msra.mxu1 %v2877_v42  ;;  %3635 = vmatprep.mubr.msk.f32.mxu1 %vm3675_vm1, %v3674_v1 }
 0x8d2   :  { %3633 = vmatprep.subr.mxu1 %v3674_v1  ;;  %3643 = vmatpush3.msra.mxu0 %v2643_v50 }
 0x8d3   :  { %3634 = vmatpush3.msra.mxu1 %v2876_v43  ;;  %3644 = vmatprep.subr.mxu0 %v3674_v1 }
 0x8d4   :  { %3636 = vmatmul.mubr.msk.f32.vlgmr.msra.gmra.mxu1 %vm1949_vm6, %v1941_v44  ;;  %3645 = vmatpush3.msra.mxu0 %v2642_v52 }
 0x97a   :  { %v2018_v54 = vpop.f32.mrf.mxu1 }
 0x97c   :  { %v3581_v56 = vpop.f32.mrf.mxu1 }
 0x97e   :  { %v2090_v58 = vpop.f32.mrf.mxu1 }
 0x97f   :  { %v2397_v60 = vpop.f32.mrf.mxu0  ;;  %v2091_v9 = vadd.f32 %v2090_v58, %v2018_v54 }
 0x980   :  { %v3588_v62 = vpop.f32.mrf.mxu1 }
 0x981   :  { %v3616_v0 = vpop.f32.mrf.mxu0 }
 0x984   :  { %v2166_v3 = vpop.f32.mrf.mxu1  ;;  %v2551_v5 = vpop.f32.mrf.mxu0 }
 0x985   :  { %v2170_v48 = vadd.f32 %v2166_v3, %v2091_v9 }
 0x986   :  { %v3595_v7 = vpop.f32.mrf.mxu1  ;;  %v3630_v8 = vpop.f32.mrf.mxu0 }
 0x988   :  { %v2243_v47 = vpop.f32.mrf.mxu1 }
 0x989   :  { %v2247_v1 = vadd.f32 %v2243_v47, %v2170_v48 }
 0x98a   :  { %v3602_v49 = vpop.f32.mrf.mxu1 }
 0x98c   :  { %v2320_v51 = vpop.f32.mrf.mxu1 }
 0x98d   :  { %v2324_v53 = vadd.f32 %v2320_v51, %v2247_v1 }
 0x98e   :  { %v3609_v55 = vpop.f32.mrf.mxu1 }
 0x98f   :  { %v2401_v57 = vadd.f32 %v2397_v60, %v2324_v53 }
 0x990   :  { %v2474_v59 = vpop.f32.mrf.mxu1 }
 0x991   :  { %v2478_v61 = vadd.f32 %v2474_v59, %v2401_v57 }
 0x992   :  { %v3623_v63 = vpop.f32.mrf.mxu1 }
 0x993   :  { %v2555_v2 = vadd.f32 %v2551_v5, %v2478_v61 }
 0x994   :  { %v2628_v4 = vpop.f32.mrf.mxu1 }
 0x995   :  { %v2632_v10 = vadd.f32 %v2628_v4, %v2555_v2 }
 0x996   :  { %v3637_v11 = vpop.f32.mrf.mxu1 }
 0x997   :  { %v2640_v12 = vadd.f32 %v2879_v6, %v2632_v10 }
 0x999   :  { %v2641_v13 = vmax.f32 %v2640_v12, 0.0 }
 0x99b   :  { %3647 = vmatmul.mubr.msk.f32.vlgmr.msra.gmra.mxu0 %vm2653_vm7, %v2641_v13 }
 0xa5b   :  { %v2723_v15 = vpop.f32.mrf.mxu0 }
 0xa5c   :  { %v2724_v16 = vadd.f32 %v2880_v14, %v2723_v15 }
 0xa5d   :  { %v3648_v17 = vpop.f32.mrf.mxu0 }
 0xa5e   :  { %2728 = vst.msk [vmem:[#allocation2] sm:$0x3] %vm2727_vm8, %v2724_v16 }
 0xa5f   :  { %3663 = shalt.err (!%p3660_p4)
}
 0xa60   :  { %2738 = dma.vmem_to_hbm [thread:$0]  %s2736_s0, 32, %s4531_s10, [#allocation3]  }
 0xa61   :  { %3672 = dma.done.wait [#allocation3], 32  }
 0xa62   :  { %3673 = vsyncadd [#allocation3], 4294967264 }
 0xa63   :  { %2742 = vsyncpa [#allocation3], 1 }

</bundles_post_ra>
